<compile_context>
chip_gen: v7x
topology: tpu7x:2x2x1
jax: 0.10.0
libtpu: 0.0.40
codegen_flags: <defaults>
</compile_context>

<pallas_src>
import jax
import jax.numpy as jnp
from jax.experimental import pallas as pl
from jax.experimental.pallas import tpu as pltpu

IN = 784        # flattened 28x28 image
H = 400         # hidden width of the PyTorch module
HP = 512        # lane-aligned padded hidden width (4 * 128), zero-padded
LATENT = 20
NCLASS = 10
ZCP = 32        # padded [eps | y] lane width (20 + 10 -> 32, 2 zero lanes)
SUBLANE = 16    # bf16 sublane packing of the x tile -> batch tiles in 16s


# ---------------------------------------------------------------------------
# Pallas kernel: fused VAE forward (encode -> reparameterize -> decode)
# ---------------------------------------------------------------------------
def vae_kernel(
    x_ref,      # (TB, 784)  bf16
    epsy_ref,   # (TB, 32)   f32: [:, :20]=eps, [:, 20:30]=y, [:, 30:32]=0
    w1_ref,     # (784, HP)  bf16
    b1_ref,     # (1, HP)    f32
    w2_ref,     # (HP, 40)   f32  fused fc21|fc22
    b2_ref,     # (1, 40)    f32
    w3z_ref,    # (20, HP)   f32  fc3 weight rows for z
    w3y_ref,    # (12, HP)   f32  fc3 weight rows for y (2 zero rows)
    b3_ref,     # (1, HP)    f32
    w4_ref,     # (HP, 784)  bf16
    b4_ref,     # (1, 784)   f32
    recon_ref,  # (TB, 784)  out f32
    stats_ref,  # (TB, 40)   out f32: [:, :20]=mu, [:, 20:40]=logvar
):
    # ---- encode: big matmul in bf16 on the MXU, f32 accumulation ----
    h1 = jnp.dot(x_ref[...], w1_ref[...],
                 preferred_element_type=jnp.float32) + b1_ref[...]
    h1 = jnp.maximum(h1, 0.0)  # relu; padded hidden cols stay exactly 0

    # latent projection kept in f32 (tiny matmul, protects mu/logvar precision)
    stats = jnp.dot(h1, w2_ref[...],
                    preferred_element_type=jnp.float32) + b2_ref[...]
    mu = stats[:, :LATENT]
    logvar = stats[:, LATENT:]

    # ---- reparameterize (f32 VPU/EUP path) ----
    epsy = epsy_ref[...]
    std = jnp.exp(0.5 * logvar)
    z = mu + epsy[:, :LATENT] * std

    # ---- decode: concat(z, y) folded into two narrow f32 matmuls ----
    h3 = (
        jnp.dot(z, w3z_ref[...], preferred_element_type=jnp.float32)
        + jnp.dot(epsy[:, LATENT:], w3y_ref[...],
                  preferred_element_type=jnp.float32)
        + b3_ref[...]
    )
    h3 = jnp.maximum(h3, 0.0)  # relu

    # big matmul in bf16 (f32 accumulate), sigmoid in f32
    logits = jnp.dot(h3.astype(jnp.bfloat16), w4_ref[...],
                     preferred_element_type=jnp.float32) + b4_ref[...]
    recon_ref[...] = jax.nn.sigmoid(logits)
    stats_ref[...] = stats


# ---------------------------------------------------------------------------
# One-time parameter preparation: transpose-layout params -> fused + padded
# ---------------------------------------------------------------------------
def prepare_params(params):
    """params: (w1, b1, w21, b21, w22, b22, w3, b3, w4, b4), weights (in, out)."""
    (w1, b1, w21, b21, w22, b22, w3, b3, w4, b4) = params
    pad = HP - H

    # Big matmul weights -> bf16 (MXU native); everything else stays f32.
    w1p = jnp.pad(w1.astype(jnp.float32), ((0, 0), (0, pad))).astype(jnp.bfloat16)
    b1p = jnp.pad(b1.astype(jnp.float32), (0, pad)).reshape(1, HP)

    w2 = jnp.concatenate([w21, w22], axis=1).astype(jnp.float32)          # (400, 40)
    w2p = jnp.pad(w2, ((0, pad), (0, 0)))                                 # (HP, 40)
    b2 = jnp.concatenate([b21, b22], axis=0).astype(jnp.float32).reshape(1, 2 * LATENT)

    w3zp = jnp.pad(w3[:LATENT].astype(jnp.float32), ((0, 0), (0, pad)))   # (20, HP)
    w3yp = jnp.pad(w3[LATENT:].astype(jnp.float32),
                   ((0, ZCP - LATENT - NCLASS), (0, pad)))                # (12, HP)
    b3p = jnp.pad(b3.astype(jnp.float32), (0, pad)).reshape(1, HP)

    w4p = jnp.pad(w4.astype(jnp.float32), ((0, pad), (0, 0))).astype(jnp.bfloat16)
    b4p = b4.astype(jnp.float32).reshape(1, IN)

    return (w1p, b1p, w2p, b2, w3zp, w3yp, b3p, w4p, b4p)


# ---------------------------------------------------------------------------
# Tiling / VMEM helpers
# ---------------------------------------------------------------------------
def _round_up(n, m):
    return ((n + m - 1) // m) * m


def _choose_tile(batch, tb_max):
    """Adaptive batch tile: small batches -> small tiles; large batches ->
    tiles up to tb_max; >=2 grid steps whenever there is enough work so that
    v7x's two TensorCores both get a share (harmless extra step on v5e/v6e)."""
    b_pad = _round_up(batch, SUBLANE)
    if b_pad <= SUBLANE:
        return b_pad
    half = _round_up(-(-b_pad // 2), SUBLANE)   # ceil(b_pad/2) rounded to 16
    return min(half, tb_max)


def _vmem_limit_bytes(tb):
    """Tight-ish scoped-VMEM request from the actual tile footprint."""
    weights = (IN * HP * 2 + HP * IN * 2                     # w1, w4 (bf16)
               + HP * 2 * LATENT * 4                         # w2 (f32)
               + LATENT * HP * 4 + (ZCP - LATENT) * HP * 4   # w3z, w3y (f32)
               + (HP + 2 * LATENT + HP + IN) * 4)            # biases (f32)
    tile_io = tb * (IN * 2 + ZCP * 4 + IN * 4 + 2 * LATENT * 4)  # x, epsy, recon, stats
    scratch = 4 * tb * HP * 4                                # h1/h3/intermediates
    total = 2 * weights + 2 * tile_io + scratch + (8 << 20)  # double-buffer + margin
    return max(24 << 20, min(total, 56 << 20))               # headroom on v7x (64 MiB)


# ---------------------------------------------------------------------------
# Wrapper
# ---------------------------------------------------------------------------
def vae_forward(x, y, eps, prepared, *, tb_max=512):
    """x: (B, 1, 28, 28) or (B, 784); y: (B, 10); eps: (B, 20)."""
    x = x.reshape(-1, IN).astype(jnp.bfloat16)   # bf16 in HBM: halves x DMA bytes
    y = y.astype(jnp.float32)
    eps = eps.astype(jnp.float32)
    B = x.shape[0]

    # Fuse eps and y into one lane-padded (B, 32) input -> single narrow DMA.
    epsy = jnp.concatenate(
        [eps, y, jnp.zeros((B, ZCP - LATENT - NCLASS), jnp.float32)], axis=1)

    tb = _choose_tile(B, tb_max)
    Bp = _round_up(B, tb)
    if Bp != B:
        x = jnp.pad(x, ((0, Bp - B), (0, 0)))
        epsy = jnp.pad(epsy, ((0, Bp - B), (0, 0)))

    (w1, b1, w2, b2, w3z, w3y, b3, w4, b4) = prepared

    def batch_spec(n):
        return pl.BlockSpec((tb, n), lambda i: (i, 0))

    def full_spec(shape):
        # Constant block index across the grid -> the weight tile stays
        # resident in VMEM and its DMA is not re-issued per step.
        return pl.BlockSpec(shape, lambda i: (0,) * len(shape))

    grid_spec = pltpu.PrefetchScalarGridSpec(
        num_scalar_prefetch=0,
        grid=(Bp // tb,),
        in_specs=[
            batch_spec(IN),             # x (bf16)
            batch_spec(ZCP),            # epsy = [eps | y | 0]
            full_spec(w1.shape),        # w1 (bf16)
            full_spec(b1.shape),        # b1
            full_spec(w2.shape),        # w2 (fused fc21|fc22)
            full_spec(b2.shape),        # b2
            full_spec(w3z.shape),       # w3z
            full_spec(w3y.shape),       # w3y
            full_spec(b3.shape),        # b3
            full_spec(w4.shape),        # w4 (bf16)
            full_spec(b4.shape),        # b4
        ],
        out_specs=[
            batch_spec(IN),             # recon
            batch_spec(2 * LATENT),     # stats = [mu | logvar]
        ],
    )

    recon, stats = pl.pallas_call(
        vae_kernel,
        out_shape=(
            jax.ShapeDtypeStruct((Bp, IN), jnp.float32),
            jax.ShapeDtypeStruct((Bp, 2 * LATENT), jnp.float32),
        ),
        grid_spec=grid_spec,
        compiler_params=pltpu.CompilerParams(
            dimension_semantics=("parallel",),     # batch grid across TCs (v7x)
            vmem_limit_bytes=_vmem_limit_bytes(tb),
        ),
    )(x, epsy, w1, b1, w2, b2, w3z, w3y, b3, w4, b4)

    recon = recon[:B]
    mu = stats[:B, :LATENT]
    logvar = stats[:B, LATENT:]
    return recon, mu, logvar


# ---------------------------------------------------------------------------
# Deterministic parameter init (synthetic; nn.Linear shapes, stored (in, out))
# ---------------------------------------------------------------------------
def init_params(key):
    def linear(key, fan_in, fan_out):
        kw, kb = jax.random.split(key)
        bound = 1.0 / jnp.sqrt(fan_in)
        w = jax.random.uniform(kw, (fan_in, fan_out), jnp.float32, -bound, bound)
        b = jax.random.uniform(kb, (fan_out,), jnp.float32, -bound, bound)
        return w, b

    k1, k21, k22, k3, k4 = jax.random.split(key, 5)
    w1, b1 = linear(k1, IN, H)
    w21, b21 = linear(k21, H, LATENT)
    w22, b22 = linear(k22, H, LATENT)
    w3, b3 = linear(k3, LATENT + NCLASS, H)   # concat(z, y) input
    w4, b4 = linear(k4, H, IN)
    return (w1, b1, w21, b21, w22, b22, w3, b3, w4, b4)


# ---------------------------------------------------------------------------
# Pure-JAX f32 reference (unfused, unpadded) for correctness checking
# ---------------------------------------------------------------------------
def vae_ref(x, y, eps, params):
    (w1, b1, w21, b21, w22, b22, w3, b3, w4, b4) = params
    x = x.reshape(-1, IN)
    h1 = jax.nn.relu(x @ w1 + b1)
    mu = h1 @ w21 + b21
    logvar = h1 @ w22 + b22
    std = jnp.exp(0.5 * logvar)
    z = mu + eps * std
    zc = jnp.concatenate([z, y], axis=1)
    h3 = jax.nn.relu(zc @ w3 + b3)
    recon = jax.nn.sigmoid(h3 @ w4 + b4)
    return recon, mu, logvar


def _check(B, key, params, prepared):
    kx, ky, ke = jax.random.split(key, 3)
    x = jax.random.uniform(kx, (B, 1, 28, 28), jnp.float32)   # MNIST-like NCHW
    y = jax.nn.one_hot(jax.random.randint(ky, (B,), 0, 10), 10).astype(jnp.float32)
    eps = jax.random.normal(ke, (B, LATENT), jnp.float32)      # torch.randn_like(std)

    recon, mu, logvar = vae_forward(x, y, eps, prepared)
    jax.block_until_ready((recon, mu, logvar))

    r_ref, mu_ref, lv_ref = vae_ref(x, y, eps, params)
    assert recon.shape == (B, IN) and mu.shape == (B, LATENT) and logvar.shape == (B, LATENT)
    # bf16 MXU path vs f32 reference -> loosened tolerances.
    assert jnp.allclose(recon, r_ref, atol=5e-2, rtol=0), "recon mismatch"
    assert jnp.allclose(mu, mu_ref, atol=5e-2, rtol=0), "mu mismatch"
    assert jnp.allclose(logvar, lv_ref, atol=5e-2, rtol=0), "logvar mismatch"


if __name__ == "__main__":
    key = jax.random.PRNGKey(0)
    kp, k_small, k_multi = jax.random.split(key, 3)

    params = init_params(kp)
    prepared = prepare_params(params)

    # Small batch: adaptive tile -> single 16-row tile (almost no padding).
    _check(8, k_small, params, prepared)
    # Slightly larger batch: exercises the multi-step grid + batch padding path.
    _check(40, k_multi, params, prepared)

    print("KERNEL_OK")
</pallas_src>

<mosaic_0001>
module attributes {stable_mosaic.version = 11 : i64} {
  func.func @vae_kernel(%arg0: i32, %arg1: memref<16x784xbf16, #tpu.memory_space<vmem>>, %arg2: memref<16x32xf32, #tpu.memory_space<vmem>>, %arg3: memref<784x512xbf16, #tpu.memory_space<vmem>>, %arg4: memref<1x512xf32, #tpu.memory_space<vmem>>, %arg5: memref<512x40xf32, #tpu.memory_space<vmem>>, %arg6: memref<1x40xf32, #tpu.memory_space<vmem>>, %arg7: memref<20x512xf32, #tpu.memory_space<vmem>>, %arg8: memref<12x512xf32, #tpu.memory_space<vmem>>, %arg9: memref<1x512xf32, #tpu.memory_space<vmem>>, %arg10: memref<512x784xbf16, #tpu.memory_space<vmem>>, %arg11: memref<1x784xf32, #tpu.memory_space<vmem>>, %arg12: memref<16x784xf32, #tpu.memory_space<vmem>>, %arg13: memref<16x40xf32, #tpu.memory_space<vmem>>) attributes {dimension_semantics = [#tpu.dimension_semantics<parallel>], iteration_bounds = array<i64: 1>, scalar_prefetch = 0 : i64, scratch_operands = 0 : i64, tpu.core_type = #tpu.core_type<tc>, window_params = [{transform_indices = @transform_0, window_bounds = array<i64: 16, 784>}, {transform_indices = @transform_1, window_bounds = array<i64: 16, 32>}, {pipeline_mode = #tpu.pipeline_mode<synchronous>, transform_indices = @transform_2, window_bounds = array<i64: 784, 512>}, {pipeline_mode = #tpu.pipeline_mode<synchronous>, transform_indices = @transform_3, window_bounds = array<i64: 1, 512>}, {pipeline_mode = #tpu.pipeline_mode<synchronous>, transform_indices = @transform_4, window_bounds = array<i64: 512, 40>}, {pipeline_mode = #tpu.pipeline_mode<synchronous>, transform_indices = @transform_5, window_bounds = array<i64: 1, 40>}, {pipeline_mode = #tpu.pipeline_mode<synchronous>, transform_indices = @transform_6, window_bounds = array<i64: 20, 512>}, {pipeline_mode = #tpu.pipeline_mode<synchronous>, transform_indices = @transform_7, window_bounds = array<i64: 12, 512>}, {pipeline_mode = #tpu.pipeline_mode<synchronous>, transform_indices = @transform_8, window_bounds = array<i64: 1, 512>}, {pipeline_mode = #tpu.pipeline_mode<synchronous>, transform_indices = @transform_9, window_bounds = array<i64: 512, 784>}, {pipeline_mode = #tpu.pipeline_mode<synchronous>, transform_indices = @transform_10, window_bounds = array<i64: 1, 784>}, {transform_indices = @transform_11, window_bounds = array<i64: 16, 784>}, {transform_indices = @transform_12, window_bounds = array<i64: 16, 40>}]} {
    %c0 = arith.constant 0 : index
    %c0_0 = arith.constant 0 : index
    %0 = vector.load %arg1[%c0, %c0_0] : memref<16x784xbf16, #tpu.memory_space<vmem>>, vector<16x784xbf16>
    %c0_1 = arith.constant 0 : index
    %c0_2 = arith.constant 0 : index
    %1 = vector.load %arg3[%c0_1, %c0_2] : memref<784x512xbf16, #tpu.memory_space<vmem>>, vector<784x512xbf16>
    %cst = arith.constant dense<0.000000e+00> : vector<16x512xf32>
    %2 = tpu.matmul %0, %1, %cst {dimension_numbers = #tpu.dot_dimension_numbers<[1], [0], [0], [1], [0, 0, 1, 1], [], []>} : vector<16x784xbf16>, vector<784x512xbf16>, vector<16x512xf32> -> vector<16x512xf32>
    %c0_3 = arith.constant 0 : index
    %c0_4 = arith.constant 0 : index
    %3 = vector.load %arg4[%c0_3, %c0_4] : memref<1x512xf32, #tpu.memory_space<vmem>>, vector<1x512xf32>
    %4 = vector.broadcast %3 : vector<1x512xf32> to vector<16x512xf32>
    %5 = arith.addf %2, %4 : vector<16x512xf32>
    %cst_5 = arith.constant 0.000000e+00 : f32
    %6 = vector.broadcast %cst_5 : f32 to vector<16x512xf32>
    %7 = arith.maximumf %5, %6 : vector<16x512xf32>
    %c0_6 = arith.constant 0 : index
    %c0_7 = arith.constant 0 : index
    %8 = vector.load %arg5[%c0_6, %c0_7] : memref<512x40xf32, #tpu.memory_space<vmem>>, vector<512x40xf32>
    %cst_8 = arith.constant dense<0.000000e+00> : vector<16x40xf32>
    %9 = tpu.matmul %7, %8, %cst_8 {dimension_numbers = #tpu.dot_dimension_numbers<[1], [0], [0], [1], [0, 0, 1, 1], [], []>} : vector<16x512xf32>, vector<512x40xf32>, vector<16x40xf32> -> vector<16x40xf32>
    %c0_9 = arith.constant 0 : index
    %c0_10 = arith.constant 0 : index
    %10 = vector.load %arg6[%c0_9, %c0_10] : memref<1x40xf32, #tpu.memory_space<vmem>>, vector<1x40xf32>
    %11 = vector.broadcast %10 : vector<1x40xf32> to vector<16x40xf32>
    %12 = arith.addf %9, %11 : vector<16x40xf32>
    %13 = vector.extract_strided_slice %12 {offsets = [0, 0], sizes = [16, 20], strides = [1, 1]} : vector<16x40xf32> to vector<16x20xf32>
    %14 = vector.extract_strided_slice %12 {offsets = [0, 20], sizes = [16, 20], strides = [1, 1]} : vector<16x40xf32> to vector<16x20xf32>
    %c0_11 = arith.constant 0 : index
    %c0_12 = arith.constant 0 : index
    %15 = vector.load %arg2[%c0_11, %c0_12] : memref<16x32xf32, #tpu.memory_space<vmem>>, vector<16x32xf32>
    %cst_13 = arith.constant 5.000000e-01 : f32
    %16 = vector.broadcast %cst_13 : f32 to vector<16x20xf32>
    %17 = arith.mulf %16, %14 : vector<16x20xf32>
    %18 = math.exp %17 : vector<16x20xf32>
    %19 = vector.extract_strided_slice %15 {offsets = [0, 0], sizes = [16, 20], strides = [1, 1]} : vector<16x32xf32> to vector<16x20xf32>
    %20 = arith.mulf %19, %18 : vector<16x20xf32>
    %21 = arith.addf %13, %20 : vector<16x20xf32>
    %c0_14 = arith.constant 0 : index
    %c0_15 = arith.constant 0 : index
    %22 = vector.load %arg7[%c0_14, %c0_15] : memref<20x512xf32, #tpu.memory_space<vmem>>, vector<20x512xf32>
    %cst_16 = arith.constant dense<0.000000e+00> : vector<16x512xf32>
    %23 = tpu.matmul %21, %22, %cst_16 {dimension_numbers = #tpu.dot_dimension_numbers<[1], [0], [0], [1], [0, 0, 1, 1], [], []>} : vector<16x20xf32>, vector<20x512xf32>, vector<16x512xf32> -> vector<16x512xf32>
    %24 = vector.extract_strided_slice %15 {offsets = [0, 20], sizes = [16, 12], strides = [1, 1]} : vector<16x32xf32> to vector<16x12xf32>
    %c0_17 = arith.constant 0 : index
    %c0_18 = arith.constant 0 : index
    %25 = vector.load %arg8[%c0_17, %c0_18] : memref<12x512xf32, #tpu.memory_space<vmem>>, vector<12x512xf32>
    %cst_19 = arith.constant dense<0.000000e+00> : vector<16x512xf32>
    %26 = tpu.matmul %24, %25, %cst_19 {dimension_numbers = #tpu.dot_dimension_numbers<[1], [0], [0], [1], [0, 0, 1, 1], [], []>} : vector<16x12xf32>, vector<12x512xf32>, vector<16x512xf32> -> vector<16x512xf32>
    %27 = arith.addf %23, %26 : vector<16x512xf32>
    %c0_20 = arith.constant 0 : index
    %c0_21 = arith.constant 0 : index
    %28 = vector.load %arg9[%c0_20, %c0_21] : memref<1x512xf32, #tpu.memory_space<vmem>>, vector<1x512xf32>
    %29 = vector.broadcast %28 : vector<1x512xf32> to vector<16x512xf32>
    %30 = arith.addf %27, %29 : vector<16x512xf32>
    %cst_22 = arith.constant 0.000000e+00 : f32
    %31 = vector.broadcast %cst_22 : f32 to vector<16x512xf32>
    %32 = arith.maximumf %30, %31 : vector<16x512xf32>
    %33 = arith.truncf %32 : vector<16x512xf32> to vector<16x512xbf16>
    %c0_23 = arith.constant 0 : index
    %c0_24 = arith.constant 0 : index
    %34 = vector.load %arg10[%c0_23, %c0_24] : memref<512x784xbf16, #tpu.memory_space<vmem>>, vector<512x784xbf16>
    %cst_25 = arith.constant dense<0.000000e+00> : vector<16x784xf32>
    %35 = tpu.matmul %33, %34, %cst_25 {dimension_numbers = #tpu.dot_dimension_numbers<[1], [0], [0], [1], [0, 0, 1, 1], [], []>} : vector<16x512xbf16>, vector<512x784xbf16>, vector<16x784xf32> -> vector<16x784xf32>
    %c0_26 = arith.constant 0 : index
    %c0_27 = arith.constant 0 : index
    %36 = vector.load %arg11[%c0_26, %c0_27] : memref<1x784xf32, #tpu.memory_space<vmem>>, vector<1x784xf32>
    %37 = vector.broadcast %36 : vector<1x784xf32> to vector<16x784xf32>
    %38 = arith.addf %35, %37 : vector<16x784xf32>
    %39 = arith.negf %38 : vector<16x784xf32>
    %40 = math.exp %39 : vector<16x784xf32>
    %cst_28 = arith.constant 1.000000e+00 : f32
    %41 = vector.broadcast %cst_28 : f32 to vector<16x784xf32>
    %42 = arith.addf %41, %40 : vector<16x784xf32>
    %43 = arith.divf %41, %42 : vector<16x784xf32>
    %c0_29 = arith.constant 0 : index
    %c0_30 = arith.constant 0 : index
    %44 = vector.load %arg12[%c0_29, %c0_30] : memref<16x784xf32, #tpu.memory_space<vmem>>, vector<16x784xf32>
    tpu.vector_store %arg12[%c0_29, %c0_30], %43 {strides = array<i32>} : memref<16x784xf32, #tpu.memory_space<vmem>>, vector<16x784xf32>,
    %c0_31 = arith.constant 0 : index
    %c0_32 = arith.constant 0 : index
    %45 = vector.load %arg13[%c0_31, %c0_32] : memref<16x40xf32, #tpu.memory_space<vmem>>, vector<16x40xf32>
    tpu.vector_store %arg13[%c0_31, %c0_32], %12 {strides = array<i32>} : memref<16x40xf32, #tpu.memory_space<vmem>>, vector<16x40xf32>,
    return
  }
  func.func @transform_0(%arg0: i32) -> (i32, i32) {
    %c0_i32 = arith.constant 0 : i32
    %c0_i32_0 = arith.constant 0 : i32
    return %arg0, %c0_i32 : i32, i32
  }
  func.func @transform_1(%arg0: i32) -> (i32, i32) {
    %c0_i32 = arith.constant 0 : i32
    %c0_i32_0 = arith.constant 0 : i32
    return %arg0, %c0_i32 : i32, i32
  }
  func.func @transform_2(%arg0: i32) -> (i32, i32) {
    %c0_i32 = arith.constant 0 : i32
    %c0_i32_0 = arith.constant 0 : i32
    %c0_i32_1 = arith.constant 0 : i32
    return %c0_i32, %c0_i32_0 : i32, i32
  }
  func.func @transform_3(%arg0: i32) -> (i32, i32) {
    %c0_i32 = arith.constant 0 : i32
    %c0_i32_0 = arith.constant 0 : i32
    %c0_i32_1 = arith.constant 0 : i32
    return %c0_i32, %c0_i32_0 : i32, i32
  }
  func.func @transform_4(%arg0: i32) -> (i32, i32) {
    %c0_i32 = arith.constant 0 : i32
    %c0_i32_0 = arith.constant 0 : i32
    %c0_i32_1 = arith.constant 0 : i32
    return %c0_i32, %c0_i32_0 : i32, i32
  }
  func.func @transform_5(%arg0: i32) -> (i32, i32) {
    %c0_i32 = arith.constant 0 : i32
    %c0_i32_0 = arith.constant 0 : i32
    %c0_i32_1 = arith.constant 0 : i32
    return %c0_i32, %c0_i32_0 : i32, i32
  }
  func.func @transform_6(%arg0: i32) -> (i32, i32) {
    %c0_i32 = arith.constant 0 : i32
    %c0_i32_0 = arith.constant 0 : i32
    %c0_i32_1 = arith.constant 0 : i32
    return %c0_i32, %c0_i32_0 : i32, i32
  }
  func.func @transform_7(%arg0: i32) -> (i32, i32) {
    %c0_i32 = arith.constant 0 : i32
    %c0_i32_0 = arith.constant 0 : i32
    %c0_i32_1 = arith.constant 0 : i32
    return %c0_i32, %c0_i32_0 : i32, i32
  }
  func.func @transform_8(%arg0: i32) -> (i32, i32) {
    %c0_i32 = arith.constant 0 : i32
    %c0_i32_0 = arith.constant 0 : i32
    %c0_i32_1 = arith.constant 0 : i32
    return %c0_i32, %c0_i32_0 : i32, i32
  }
  func.func @transform_9(%arg0: i32) -> (i32, i32) {
    %c0_i32 = arith.constant 0 : i32
    %c0_i32_0 = arith.constant 0 : i32
    %c0_i32_1 = arith.constant 0 : i32
    return %c0_i32, %c0_i32_0 : i32, i32
  }
  func.func @transform_10(%arg0: i32) -> (i32, i32) {
    %c0_i32 = arith.constant 0 : i32
    %c0_i32_0 = arith.constant 0 : i32
    %c0_i32_1 = arith.constant 0 : i32
    return %c0_i32, %c0_i32_0 : i32, i32
  }
  func.func @transform_11(%arg0: i32) -> (i32, i32) {
    %c0_i32 = arith.constant 0 : i32
    %c0_i32_0 = arith.constant 0 : i32
    return %arg0, %c0_i32 : i32, i32
  }
  func.func @transform_12(%arg0: i32) -> (i32, i32) {
    %c0_i32 = arith.constant 0 : i32
    %c0_i32_0 = arith.constant 0 : i32
    return %arg0, %c0_i32 : i32, i32
  }
}

</mosaic_0001>

<bundles_post_ra>
// kernel: tpu_custom_call.1
= control target key start
LH: loop header
LB: loop body
LE: loop exit
PB: predicated region body
PF: predicated region fallthrough
CT: control target
= control target key end

     0   :  { %18 = vsyncpa [#allocation3], 0  ;;  %vm1284_vm0 = vcmask 130048   ;;  %s7464_s0 = inlined_call_operand.vmem [shape: bf16[16,784], index: 0, kind: input, shape index: {}]   ;;  %s7465_s1 = inlined_call_operand.vmem [shape: f32[16,32], index: 1, kind: input, shape index: {}]   ;;  %s7466_s2 = inlined_call_operand.vmem [shape: bf16[784,512], index: 2, kind: input, shape index: {}]   ;;  %s7467_s3 = inlined_call_operand.vmem [shape: f32[1,512], index: 3, kind: input, shape index: {}]   ;;  %s7468_s4 = inlined_call_operand.vmem [shape: f32[512,40], index: 4, kind: input, shape index: {}]   ;;  %s7469_s5 = inlined_call_operand.vmem [shape: f32[1,40], index: 5, kind: input, shape index: {}]   ;;  %s7470_s6 = inlined_call_operand.vmem [shape: f32[20,512], index: 6, kind: input, shape index: {}]   ;;  %s7471_s7 = inlined_call_operand.vmem [shape: f32[12,512], index: 7, kind: input, shape index: {}]   ;;  %s7472_s8 = inlined_call_operand.vmem [shape: f32[1,512], index: 8, kind: input, shape index: {}]   ;;  %s7473_s9 = inlined_call_operand.vmem [shape: bf16[512,784], index: 9, kind: input, shape index: {}]   ;;  %s7474_s10 = inlined_call_operand.vmem [shape: f32[1,784], index: 10, kind: input, shape index: {}]   ;;  %s7475_s11 = inlined_call_operand.hbm [shape: f32[16,784], index: 11, kind: output, shape index: {0}]   ;;  %s7476_s12 = inlined_call_operand.hbm [shape: f32[16,40], index: 12, kind: output, shape index: {1}]  }
   0x1   :  { %v4950_v0 = vld [vmem:[%s7466_s2 + $0x4] ss:$16 sps:$4 sm:$0xff]   ;;  %v4952_v1 = vld [vmem:[%s7466_s2 + $0xc] ss:$16 sps:$4 sm:$0xff]   ;;  %v4954_v2 = vld [vmem:[%s7466_s2] ss:$16 sps:$4 sm:$0xff]  }
   0x2   :  { %1288 = vmatprep.subr.bf16.mxu0 %v4950_v0  ;;  %v4955_v3 = vld [vmem:[%s7466_s2 + $0x8] ss:$16 sps:$4 sm:$0xff]   ;;  %1460 = vmatprep.subr.bf16.mxu1 %v4952_v1  ;;  %v4956_v4 = vld [vmem:[%s7466_s2 + $0x24] ss:$16 sps:$4 sm:$0xff]   ;;  %v4958_v5 = vld [vmem:[%s7466_s2 + $0x2c] ss:$16 sps:$4 sm:$0xff]  }
   0x3   :  { %1289 = vmatpush1.bf16.msra.mxu0 %v4954_v2  ;;  %1461 = vmatpush1.bf16.msra.mxu1 %v4955_v3  ;;  %v4960_v6 = vld [vmem:[%s7466_s2 + $0x20] ss:$16 sps:$4 sm:$0xff]   ;;  %v4961_v7 = vld [vmem:[%s7466_s2 + $0x28] ss:$16 sps:$4 sm:$0xff]   ;;  %v4962_v8 = vld [vmem:[%s7466_s2 + $0x44] ss:$16 sps:$4 sm:$0xff]  }
   0x4   :  { %1290 = vmatprep.subr.bf16.mxu0 %v4956_v4  ;;  %1462 = vmatprep.subr.bf16.mxu1 %v4958_v5  ;;  %v4964_v9 = vld [vmem:[%s7466_s2 + $0x4c] ss:$16 sps:$4 sm:$0xff]   ;;  %v4966_v10 = vld [vmem:[%s7466_s2 + $0x40] ss:$16 sps:$4 sm:$0xff]   ;;  %v4967_v11 = vld [vmem:[%s7466_s2 + $0x48] ss:$16 sps:$4 sm:$0xff]  }
   0x5   :  { %v4968_v12 = vld [vmem:[%s7466_s2 + $0x64] ss:$16 sps:$4 sm:$0xff]   ;;  %v4970_v13 = vld [vmem:[%s7466_s2 + $0x6c] ss:$16 sps:$4 sm:$0xff]   ;;  %v4972_v14 = vld [vmem:[%s7466_s2 + $0x60] ss:$16 sps:$4 sm:$0xff]  }
   0x6   :  { %v4973_v15 = vld [vmem:[%s7466_s2 + $0x68] ss:$16 sps:$4 sm:$0xff]   ;;  %v4974_v16 = vld [vmem:[%s7466_s2 + $0x84] ss:$16 sps:$4 sm:$0xff]   ;;  %v4976_v17 = vld [vmem:[%s7466_s2 + $0x8c] ss:$16 sps:$4 sm:$0xff]  }
   0x7   :  { %1291 = vmatpush1.bf16.msra.mxu0 %v4960_v6  ;;  %1463 = vmatpush1.bf16.msra.mxu1 %v4961_v7  ;;  %v4978_v18 = vld [vmem:[%s7466_s2 + $0x80] ss:$16 sps:$4 sm:$0xff]   ;;  %v4979_v19 = vld [vmem:[%s7466_s2 + $0x88] ss:$16 sps:$4 sm:$0xff]   ;;  %v4980_v20 = vld [vmem:[%s7466_s2 + $0xa4] ss:$16 sps:$4 sm:$0xff]  }
   0x8   :  { %1292 = vmatprep.subr.bf16.mxu0 %v4962_v8  ;;  %1464 = vmatprep.subr.bf16.mxu1 %v4964_v9  ;;  %v4982_v21 = vld [vmem:[%s7466_s2 + $0xac] ss:$16 sps:$4 sm:$0xff]   ;;  %v4984_v22 = vld [vmem:[%s7466_s2 + $0xa0] ss:$16 sps:$4 sm:$0xff]   ;;  %v4985_v23 = vld [vmem:[%s7466_s2 + $0xa8] ss:$16 sps:$4 sm:$0xff]  }
   0x9   :  { %v4986_v24 = vld [vmem:[%s7466_s2 + $0xc4] ss:$16 sps:$4 sm:$0xff]   ;;  %v4988_v25 = vld [vmem:[%s7466_s2 + $0xcc] ss:$16 sps:$4 sm:$0xff]   ;;  %v4990_v26 = vld [vmem:[%s7466_s2 + $0xc0] ss:$16 sps:$4 sm:$0xff]  }
   0xa   :  { %v4991_v27 = vld [vmem:[%s7466_s2 + $0xc8] ss:$16 sps:$4 sm:$0xff]   ;;  %v4992_v28 = vld [vmem:[%s7466_s2 + $0xe4] ss:$16 sps:$4 sm:$0xff]   ;;  %v4994_v29 = vld [vmem:[%s7466_s2 + $0xec] ss:$16 sps:$4 sm:$0xff]  }
   0xb   :  { %1293 = vmatpush1.bf16.msra.mxu0 %v4966_v10  ;;  %1465 = vmatpush1.bf16.msra.mxu1 %v4967_v11  ;;  %v4996_v30 = vld [vmem:[%s7466_s2 + $0xe0] ss:$16 sps:$4 sm:$0xff]   ;;  %v4997_v31 = vld [vmem:[%s7466_s2 + $0xe8] ss:$16 sps:$4 sm:$0xff]   ;;  %v4998_v32 = vld [vmem:[%s7466_s2 + $0x104] ss:$16 sps:$4 sm:$0xff]  }
   0xc   :  { %1294 = vmatprep.subr.bf16.mxu0 %v4968_v12  ;;  %1466 = vmatprep.subr.bf16.mxu1 %v4970_v13  ;;  %v5000_v33 = vld [vmem:[%s7466_s2 + $0x10c] ss:$16 sps:$4 sm:$0xff]   ;;  %v5002_v34 = vld [vmem:[%s7466_s2 + $0x100] ss:$16 sps:$4 sm:$0xff]   ;;  %v5003_v35 = vld [vmem:[%s7466_s2 + $0x108] ss:$16 sps:$4 sm:$0xff]  }
   0xd   :  { %v5004_v36 = vld [vmem:[%s7466_s2 + $0x124] ss:$16 sps:$4 sm:$0xff]   ;;  %v5006_v37 = vld [vmem:[%s7466_s2 + $0x12c] ss:$16 sps:$4 sm:$0xff]   ;;  %v5008_v38 = vld [vmem:[%s7466_s2 + $0x120] ss:$16 sps:$4 sm:$0xff]  }
   0xe   :  { %v5009_v39 = vld [vmem:[%s7466_s2 + $0x128] ss:$16 sps:$4 sm:$0xff]   ;;  %v5010_v40 = vld [vmem:[%s7466_s2 + $0x144] ss:$16 sps:$4 sm:$0xff]   ;;  %v5012_v41 = vld [vmem:[%s7466_s2 + $0x14c] ss:$16 sps:$4 sm:$0xff]  }
   0xf   :  { %1295 = vmatpush1.bf16.msra.mxu0 %v4972_v14  ;;  %1467 = vmatpush1.bf16.msra.mxu1 %v4973_v15  ;;  %v5014_v42 = vld [vmem:[%s7466_s2 + $0x140] ss:$16 sps:$4 sm:$0xff]   ;;  %v5015_v43 = vld [vmem:[%s7466_s2 + $0x148] ss:$16 sps:$4 sm:$0xff]   ;;  %v5016_v44 = vld [vmem:[%s7466_s2 + $0x164] ss:$16 sps:$4 sm:$0xff]  }
  0x10   :  { %1296 = vmatprep.subr.bf16.mxu0 %v4974_v16  ;;  %1468 = vmatprep.subr.bf16.mxu1 %v4976_v17  ;;  %v5018_v45 = vld [vmem:[%s7466_s2 + $0x16c] ss:$16 sps:$4 sm:$0xff]   ;;  %v5020_v46 = vld [vmem:[%s7466_s2 + $0x160] ss:$16 sps:$4 sm:$0xff]   ;;  %v5021_v47 = vld [vmem:[%s7466_s2 + $0x168] ss:$16 sps:$4 sm:$0xff]  }
  0x11   :  { %v5048_v48 = vld [vmem:[%s7464_s0 + $0x4] ss:$28 sps:$4 sm:$0xff]   ;;  %v5024_v50 = vld [vmem:[%s7466_s2 + $0x18c] ss:$16 sps:$4 sm:$0xff]   ;;  %v5027_v52 = vld [vmem:[%s7466_s2 + $0x188] ss:$16 sps:$4 sm:$0xff]  }
  0x12   :  { %v5022_v49 = vld [vmem:[%s7466_s2 + $0x184] ss:$16 sps:$4 sm:$0xff]   ;;  %1320 = vmatprep.mubr.bf16.mxu0 %v5048_v48  ;;  %1492 = vmatprep.mubr.bf16.mxu1 %v5048_v48  ;;  %v5026_v51 = vld [vmem:[%s7466_s2 + $0x180] ss:$16 sps:$4 sm:$0xff]   ;;  %v5030_v54 = vld [vmem:[%s7466_s2 + $0x1ac] ss:$16 sps:$4 sm:$0xff]  }
  0x13   :  { %1297 = vmatpush1.bf16.msra.mxu0 %v4978_v18  ;;  %1469 = vmatpush1.bf16.msra.mxu1 %v4979_v19  ;;  %v5028_v53 = vld [vmem:[%s7466_s2 + $0x1a4] ss:$16 sps:$4 sm:$0xff]   ;;  %v5032_v55 = vld [vmem:[%s7466_s2 + $0x1a0] ss:$16 sps:$4 sm:$0xff]   ;;  %v5033_v56 = vld [vmem:[%s7466_s2 + $0x1a8] ss:$16 sps:$4 sm:$0xff]  }
  0x14   :  { %1298 = vmatprep.subr.bf16.mxu0 %v4980_v20  ;;  %1470 = vmatprep.subr.bf16.mxu1 %v4982_v21  ;;  %v5034_v57 = vld [vmem:[%s7466_s2 + $0x1c4] ss:$16 sps:$4 sm:$0xff]   ;;  %v5036_v58 = vld [vmem:[%s7466_s2 + $0x1cc] ss:$16 sps:$4 sm:$0xff]   ;;  %v5038_v59 = vld [vmem:[%s7466_s2 + $0x1c0] ss:$16 sps:$4 sm:$0xff]  }
  0x15   :  { %v5039_v60 = vld [vmem:[%s7466_s2 + $0x1c8] ss:$16 sps:$4 sm:$0xff]   ;;  %v5040_v61 = vld [vmem:[%s7466_s2 + $0x1e4] ss:$16 sps:$4 sm:$0xff]   ;;  %v5042_v62 = vld [vmem:[%s7466_s2 + $0x1ec] ss:$16 sps:$4 sm:$0xff]  }
  0x16   :  { %v5044_v63 = vld [vmem:[%s7466_s2 + $0x1e0] ss:$16 sps:$4 sm:$0xff]   ;;  %v5045_v0 = vld [vmem:[%s7466_s2 + $0x1e8] ss:$16 sps:$4 sm:$0xff]   ;;  %v5051_v1 = vld [vmem:[%s7466_s2 + $0x204] ss:$16 sps:$4 sm:$0xff]  }
  0x17   :  { %1299 = vmatpush1.bf16.msra.mxu0 %v4984_v22  ;;  %1471 = vmatpush1.bf16.msra.mxu1 %v4985_v23  ;;  %v5054_v2 = vld [vmem:[%s7466_s2 + $0x20c] ss:$16 sps:$4 sm:$0xff]   ;;  %v5049_v4 = vld [vmem:[%s7466_s2 + $0x200] ss:$16 sps:$4 sm:$0xff]   ;;  %v5052_v5 = vld [vmem:[%s7466_s2 + $0x208] ss:$16 sps:$4 sm:$0xff]  }
  0x18   :  { %1300 = vmatprep.subr.bf16.mxu0 %v4986_v24  ;;  %1472 = vmatprep.subr.bf16.mxu1 %v4988_v25  ;;  %v5046_v3 = vld [vmem:[%s7464_s0] ss:$28 sps:$4 sm:$0xff]   ;;  %v5057_v6 = vld [vmem:[%s7466_s2 + $0x224] ss:$16 sps:$4 sm:$0xff]   ;;  %v5058_v9 = vld [vmem:[%s7466_s2 + $0x228] ss:$16 sps:$4 sm:$0xff]  }
  0x19   :  { %v5060_v7 = vld [vmem:[%s7466_s2 + $0x22c] ss:$16 sps:$4 sm:$0xff]   ;;  %v5055_v8 = vld [vmem:[%s7466_s2 + $0x220] ss:$16 sps:$4 sm:$0xff]   ;;  %v5063_v10 = vld [vmem:[%s7466_s2 + $0x244] ss:$16 sps:$4 sm:$0xff]  }
  0x1a   :  { %v5066_v11 = vld [vmem:[%s7466_s2 + $0x24c] ss:$16 sps:$4 sm:$0xff]   ;;  %v5061_v12 = vld [vmem:[%s7466_s2 + $0x240] ss:$16 sps:$4 sm:$0xff]   ;;  %v5064_v13 = vld [vmem:[%s7466_s2 + $0x248] ss:$16 sps:$4 sm:$0xff]  }
  0x1b   :  { %1301 = vmatpush1.bf16.msra.mxu0 %v4990_v26  ;;  %1473 = vmatpush1.bf16.msra.mxu1 %v4991_v27  ;;  %v5069_v14 = vld [vmem:[%s7466_s2 + $0x264] ss:$16 sps:$4 sm:$0xff]   ;;  %v5072_v15 = vld [vmem:[%s7466_s2 + $0x26c] ss:$16 sps:$4 sm:$0xff]   ;;  %v5067_v16 = vld [vmem:[%s7466_s2 + $0x260] ss:$16 sps:$4 sm:$0xff]  }
  0x1c   :  { %1302 = vmatprep.subr.bf16.mxu0 %v4992_v28  ;;  %1474 = vmatprep.subr.bf16.mxu1 %v4994_v29  ;;  %v5070_v17 = vld [vmem:[%s7466_s2 + $0x268] ss:$16 sps:$4 sm:$0xff]   ;;  %v5075_v18 = vld [vmem:[%s7466_s2 + $0x284] ss:$16 sps:$4 sm:$0xff]   ;;  %v5078_v19 = vld [vmem:[%s7466_s2 + $0x28c] ss:$16 sps:$4 sm:$0xff]  }
  0x1d   :  { %v5073_v20 = vld [vmem:[%s7466_s2 + $0x280] ss:$16 sps:$4 sm:$0xff]   ;;  %v5076_v21 = vld [vmem:[%s7466_s2 + $0x288] ss:$16 sps:$4 sm:$0xff]   ;;  %v5081_v22 = vld [vmem:[%s7466_s2 + $0x2a4] ss:$16 sps:$4 sm:$0xff]  }
  0x1e   :  { %v5084_v23 = vld [vmem:[%s7466_s2 + $0x2ac] ss:$16 sps:$4 sm:$0xff]   ;;  %v5079_v24 = vld [vmem:[%s7466_s2 + $0x2a0] ss:$16 sps:$4 sm:$0xff]   ;;  %v5082_v25 = vld [vmem:[%s7466_s2 + $0x2a8] ss:$16 sps:$4 sm:$0xff]  }
  0x1f   :  { %1303 = vmatpush1.bf16.msra.mxu0 %v4996_v30  ;;  %1475 = vmatpush1.bf16.msra.mxu1 %v4997_v31  ;;  %v5087_v26 = vld [vmem:[%s7466_s2 + $0x2c4] ss:$16 sps:$4 sm:$0xff]   ;;  %v5090_v27 = vld [vmem:[%s7466_s2 + $0x2cc] ss:$16 sps:$4 sm:$0xff]   ;;  %v5085_v28 = vld [vmem:[%s7466_s2 + $0x2c0] ss:$16 sps:$4 sm:$0xff]  }
  0x20   :  { %1304 = vmatprep.subr.bf16.mxu0 %v4998_v32  ;;  %1476 = vmatprep.subr.bf16.mxu1 %v5000_v33  ;;  %v5088_v29 = vld [vmem:[%s7466_s2 + $0x2c8] ss:$16 sps:$4 sm:$0xff]   ;;  %v5093_v31 = vld [vmem:[%s7466_s2 + $0x2e4] ss:$16 sps:$4 sm:$0xff]   ;;  %v5096_v32 = vld [vmem:[%s7466_s2 + $0x2ec] ss:$16 sps:$4 sm:$0xff]  }
  0x21   :  { %v5147_v30 = vld [vmem:[%s7464_s0 + $0xc] ss:$28 sps:$4 sm:$0xff]   ;;  %v5091_v33 = vld [vmem:[%s7466_s2 + $0x2e0] ss:$16 sps:$4 sm:$0xff]  }
  0x22   :  { %v5120_v48 = vld [vmem:[%s7466_s2 + $0x36c] ss:$16 sps:$4 sm:$0xff]  }
  0x23   :  { %1305 = vmatpush1.bf16.msra.mxu0 %v5002_v34  ;;  %1477 = vmatpush1.bf16.msra.mxu1 %v5003_v35  ;;  %v5094_v34 = vld [vmem:[%s7466_s2 + $0x2e8] ss:$16 sps:$4 sm:$0xff]   ;;  %v5099_v35 = vld [vmem:[%s7466_s2 + $0x304] ss:$16 sps:$4 sm:$0xff]  }
  0x24   :  { %1306 = vmatprep.subr.bf16.mxu0 %v5004_v36  ;;  %1478 = vmatprep.subr.bf16.mxu1 %v5006_v37  ;;  %v5102_v36 = vld [vmem:[%s7466_s2 + $0x30c] ss:$16 sps:$4 sm:$0xff]   ;;  %v5097_v37 = vld [vmem:[%s7466_s2 + $0x300] ss:$16 sps:$4 sm:$0xff]  }
  0x27   :  { %1307 = vmatpush1.bf16.msra.mxu0 %v5008_v38  ;;  %1479 = vmatpush1.bf16.msra.mxu1 %v5009_v39  ;;  %v5100_v38 = vld [vmem:[%s7466_s2 + $0x308] ss:$16 sps:$4 sm:$0xff]   ;;  %v5105_v39 = vld [vmem:[%s7466_s2 + $0x324] ss:$16 sps:$4 sm:$0xff]  }
  0x28   :  { %1308 = vmatprep.subr.bf16.mxu0 %v5010_v40  ;;  %1480 = vmatprep.subr.bf16.mxu1 %v5012_v41  ;;  %v5108_v40 = vld [vmem:[%s7466_s2 + $0x32c] ss:$16 sps:$4 sm:$0xff]   ;;  %v5103_v41 = vld [vmem:[%s7466_s2 + $0x320] ss:$16 sps:$4 sm:$0xff]  }
  0x2b   :  { %1309 = vmatpush1.bf16.msra.mxu0 %v5014_v42  ;;  %1481 = vmatpush1.bf16.msra.mxu1 %v5015_v43  ;;  %v5106_v42 = vld [vmem:[%s7466_s2 + $0x328] ss:$16 sps:$4 sm:$0xff]   ;;  %v5111_v43 = vld [vmem:[%s7466_s2 + $0x344] ss:$16 sps:$4 sm:$0xff]  }
  0x2c   :  { %1310 = vmatprep.subr.bf16.mxu0 %v5016_v44  ;;  %1482 = vmatprep.subr.bf16.mxu1 %v5018_v45  ;;  %v5114_v44 = vld [vmem:[%s7466_s2 + $0x34c] ss:$16 sps:$4 sm:$0xff]   ;;  %v5109_v45 = vld [vmem:[%s7466_s2 + $0x340] ss:$16 sps:$4 sm:$0xff]  }
  0x2f   :  { %1311 = vmatpush1.bf16.msra.mxu0 %v5020_v46  ;;  %1483 = vmatpush1.bf16.msra.mxu1 %v5021_v47  ;;  %v5112_v46 = vld [vmem:[%s7466_s2 + $0x348] ss:$16 sps:$4 sm:$0xff]   ;;  %v5117_v47 = vld [vmem:[%s7466_s2 + $0x364] ss:$16 sps:$4 sm:$0xff]  }
  0x30   :  { %1312 = vmatprep.subr.bf16.mxu0 %v5022_v49  ;;  %1484 = vmatprep.subr.bf16.mxu1 %v5024_v50  ;;  %v5115_v49 = vld [vmem:[%s7466_s2 + $0x360] ss:$16 sps:$4 sm:$0xff]   ;;  %v5118_v50 = vld [vmem:[%s7466_s2 + $0x368] ss:$16 sps:$4 sm:$0xff]  }
  0x33   :  { %1313 = vmatpush1.bf16.msra.mxu0 %v5026_v51  ;;  %1485 = vmatpush1.bf16.msra.mxu1 %v5027_v52  ;;  %v5123_v51 = vld [vmem:[%s7466_s2 + $0x384] ss:$16 sps:$4 sm:$0xff]   ;;  %v5126_v52 = vld [vmem:[%s7466_s2 + $0x38c] ss:$16 sps:$4 sm:$0xff]  }
  0x34   :  { %1314 = vmatprep.subr.bf16.mxu0 %v5028_v53  ;;  %1486 = vmatprep.subr.bf16.mxu1 %v5030_v54  ;;  %v5121_v53 = vld [vmem:[%s7466_s2 + $0x380] ss:$16 sps:$4 sm:$0xff]   ;;  %v5124_v54 = vld [vmem:[%s7466_s2 + $0x388] ss:$16 sps:$4 sm:$0xff]  }
  0x37   :  { %1315 = vmatpush1.bf16.msra.mxu0 %v5032_v55  ;;  %1487 = vmatpush1.bf16.msra.mxu1 %v5033_v56  ;;  %v5129_v55 = vld [vmem:[%s7466_s2 + $0x3a4] ss:$16 sps:$4 sm:$0xff]   ;;  %v5132_v56 = vld [vmem:[%s7466_s2 + $0x3ac] ss:$16 sps:$4 sm:$0xff]  }
  0x38   :  { %1316 = vmatprep.subr.bf16.mxu0 %v5034_v57  ;;  %1488 = vmatprep.subr.bf16.mxu1 %v5036_v58  ;;  %v5127_v57 = vld [vmem:[%s7466_s2 + $0x3a0] ss:$16 sps:$4 sm:$0xff]   ;;  %v5130_v58 = vld [vmem:[%s7466_s2 + $0x3a8] ss:$16 sps:$4 sm:$0xff]  }
  0x3b   :  { %1317 = vmatpush1.bf16.msra.mxu0 %v5038_v59  ;;  %1489 = vmatpush1.bf16.msra.mxu1 %v5039_v60  ;;  %v5135_v59 = vld [vmem:[%s7466_s2 + $0x3c4] ss:$16 sps:$4 sm:$0xff]   ;;  %v5138_v60 = vld [vmem:[%s7466_s2 + $0x3cc] ss:$16 sps:$4 sm:$0xff]  }
  0x3c   :  { %1318 = vmatprep.subr.bf16.mxu0 %v5040_v61  ;;  %1490 = vmatprep.subr.bf16.mxu1 %v5042_v62  ;;  %v5133_v61 = vld [vmem:[%s7466_s2 + $0x3c0] ss:$16 sps:$4 sm:$0xff]   ;;  %v5136_v62 = vld [vmem:[%s7466_s2 + $0x3c8] ss:$16 sps:$4 sm:$0xff]  }
  0x3f   :  { %1319 = vmatpush1.bf16.msra.mxu0 %v5044_v63  ;;  %1491 = vmatpush1.bf16.msra.mxu1 %v5045_v0  ;;  %v5141_v63 = vld [vmem:[%s7466_s2 + $0x3e4] ss:$16 sps:$4 sm:$0xff]   ;;  %v5144_v0 = vld [vmem:[%s7466_s2 + $0x3ec] ss:$16 sps:$4 sm:$0xff]  }
  0x40   :  { %1331 = vmatprep.subr.bf16.mxu0 %v5051_v1  ;;  %1503 = vmatprep.subr.bf16.mxu1 %v5054_v2  ;;  %v5139_v1 = vld [vmem:[%s7466_s2 + $0x3e0] ss:$16 sps:$4 sm:$0xff]   ;;  %v5142_v2 = vld [vmem:[%s7466_s2 + $0x3e8] ss:$16 sps:$4 sm:$0xff]  }
  0x42   :  { %1321 = vmatmul.mubr.bf16.vlgmr.msra.gmra.mrb[0].mxu0 %v5046_v3  ;;  %1493 = vmatmul.mubr.bf16.vlgmr.msra.gmra.mrb[0].mxu1 %v5046_v3  ;;  %v5150_v3 = vld [vmem:[%s7466_s2 + $0x404] ss:$16 sps:$4 sm:$0xff]  }
  0x43   :  { %1332 = vmatpush1.bf16.msra.mxu0 %v5049_v4  ;;  %1504 = vmatpush1.bf16.msra.mxu1 %v5052_v5  ;;  %v5153_v4 = vld [vmem:[%s7466_s2 + $0x40c] ss:$16 sps:$4 sm:$0xff]   ;;  %v5145_v5 = vld [vmem:[%s7464_s0 + $0x8] ss:$28 sps:$4 sm:$0xff]  }
  0x44   :  { %1333 = vmatprep.subr.bf16.mxu0 %v5057_v6  ;;  %1505 = vmatprep.subr.bf16.mxu1 %v5060_v7  ;;  %v5148_v6 = vld [vmem:[%s7466_s2 + $0x400] ss:$16 sps:$4 sm:$0xff]   ;;  %v5151_v7 = vld [vmem:[%s7466_s2 + $0x408] ss:$16 sps:$4 sm:$0xff]  }
  0x45   :  { %1363 = vmatprep.mubr.bf16.mxu0 %v5147_v30  ;;  %1535 = vmatprep.mubr.bf16.mxu1 %v5147_v30  ;;  %v5189_v30 = vld [vmem:[%s7466_s2 + $0x4cc] ss:$16 sps:$4 sm:$0xff]  }
  0x47   :  { %1334 = vmatpush1.bf16.msra.mxu0 %v5055_v8  ;;  %1506 = vmatpush1.bf16.msra.mxu1 %v5058_v9  ;;  %v5156_v8 = vld [vmem:[%s7466_s2 + $0x424] ss:$16 sps:$4 sm:$0xff]   ;;  %v5159_v9 = vld [vmem:[%s7466_s2 + $0x42c] ss:$16 sps:$4 sm:$0xff]  }
  0x48   :  { %1335 = vmatprep.subr.bf16.mxu0 %v5063_v10  ;;  %1507 = vmatprep.subr.bf16.mxu1 %v5066_v11  ;;  %v5154_v10 = vld [vmem:[%s7466_s2 + $0x420] ss:$16 sps:$4 sm:$0xff]   ;;  %v5157_v11 = vld [vmem:[%s7466_s2 + $0x428] ss:$16 sps:$4 sm:$0xff]  }
  0x4b   :  { %1336 = vmatpush1.bf16.msra.mxu0 %v5061_v12  ;;  %1508 = vmatpush1.bf16.msra.mxu1 %v5064_v13  ;;  %v5246_v12 = vld [vmem:[%s7464_s0 + $0x14] ss:$28 sps:$4 sm:$0xff]  }
  0x4c   :  { %1337 = vmatprep.subr.bf16.mxu0 %v5069_v14  ;;  %1509 = vmatprep.subr.bf16.mxu1 %v5072_v15  ;;  %v5162_v13 = vld [vmem:[%s7466_s2 + $0x444] ss:$16 sps:$4 sm:$0xff]   ;;  %v5165_v14 = vld [vmem:[%s7466_s2 + $0x44c] ss:$16 sps:$4 sm:$0xff]   ;;  %v5160_v15 = vld [vmem:[%s7466_s2 + $0x440] ss:$16 sps:$4 sm:$0xff]  }
  0x4f   :  { %1338 = vmatpush1.bf16.msra.mxu0 %v5067_v16  ;;  %1510 = vmatpush1.bf16.msra.mxu1 %v5070_v17  ;;  %v5163_v16 = vld [vmem:[%s7466_s2 + $0x448] ss:$16 sps:$4 sm:$0xff]   ;;  %v5168_v17 = vld [vmem:[%s7466_s2 + $0x464] ss:$16 sps:$4 sm:$0xff]  }
  0x50   :  { %1339 = vmatprep.subr.bf16.mxu0 %v5075_v18  ;;  %1511 = vmatprep.subr.bf16.mxu1 %v5078_v19  ;;  %v5171_v18 = vld [vmem:[%s7466_s2 + $0x46c] ss:$16 sps:$4 sm:$0xff]   ;;  %v5166_v19 = vld [vmem:[%s7466_s2 + $0x460] ss:$16 sps:$4 sm:$0xff]  }
  0x53   :  { %1340 = vmatpush1.bf16.msra.mxu0 %v5073_v20  ;;  %1512 = vmatpush1.bf16.msra.mxu1 %v5076_v21  ;;  %v5169_v20 = vld [vmem:[%s7466_s2 + $0x468] ss:$16 sps:$4 sm:$0xff]   ;;  %v5174_v21 = vld [vmem:[%s7466_s2 + $0x484] ss:$16 sps:$4 sm:$0xff]  }
  0x54   :  { %1341 = vmatprep.subr.bf16.mxu0 %v5081_v22  ;;  %1513 = vmatprep.subr.bf16.mxu1 %v5084_v23  ;;  %v5177_v22 = vld [vmem:[%s7466_s2 + $0x48c] ss:$16 sps:$4 sm:$0xff]   ;;  %v5172_v23 = vld [vmem:[%s7466_s2 + $0x480] ss:$16 sps:$4 sm:$0xff]  }
  0x57   :  { %1342 = vmatpush1.bf16.msra.mxu0 %v5079_v24  ;;  %1514 = vmatpush1.bf16.msra.mxu1 %v5082_v25  ;;  %v5175_v24 = vld [vmem:[%s7466_s2 + $0x488] ss:$16 sps:$4 sm:$0xff]   ;;  %v5180_v25 = vld [vmem:[%s7466_s2 + $0x4a4] ss:$16 sps:$4 sm:$0xff]  }
  0x58   :  { %1343 = vmatprep.subr.bf16.mxu0 %v5087_v26  ;;  %1515 = vmatprep.subr.bf16.mxu1 %v5090_v27  ;;  %v5183_v26 = vld [vmem:[%s7466_s2 + $0x4ac] ss:$16 sps:$4 sm:$0xff]   ;;  %v5178_v27 = vld [vmem:[%s7466_s2 + $0x4a0] ss:$16 sps:$4 sm:$0xff]  }
  0x5b   :  { %1344 = vmatpush1.bf16.msra.mxu0 %v5085_v28  ;;  %1516 = vmatpush1.bf16.msra.mxu1 %v5088_v29  ;;  %v5181_v28 = vld [vmem:[%s7466_s2 + $0x4a8] ss:$16 sps:$4 sm:$0xff]   ;;  %v5186_v29 = vld [vmem:[%s7466_s2 + $0x4c4] ss:$16 sps:$4 sm:$0xff]  }
  0x5c   :  { %1345 = vmatprep.subr.bf16.mxu0 %v5093_v31  ;;  %1517 = vmatprep.subr.bf16.mxu1 %v5096_v32  ;;  %v5184_v31 = vld [vmem:[%s7466_s2 + $0x4c0] ss:$16 sps:$4 sm:$0xff]   ;;  %v5187_v32 = vld [vmem:[%s7466_s2 + $0x4c8] ss:$16 sps:$4 sm:$0xff]  }
  0x5f   :  { %1346 = vmatpush1.bf16.msra.mxu0 %v5091_v33  ;;  %1518 = vmatpush1.bf16.msra.mxu1 %v5094_v34  ;;  %v5192_v33 = vld [vmem:[%s7466_s2 + $0x4e4] ss:$16 sps:$4 sm:$0xff]   ;;  %v5195_v34 = vld [vmem:[%s7466_s2 + $0x4ec] ss:$16 sps:$4 sm:$0xff]  }
  0x60   :  { %1347 = vmatprep.subr.bf16.mxu0 %v5099_v35  ;;  %1519 = vmatprep.subr.bf16.mxu1 %v5102_v36  ;;  %v5190_v35 = vld [vmem:[%s7466_s2 + $0x4e0] ss:$16 sps:$4 sm:$0xff]   ;;  %v5193_v36 = vld [vmem:[%s7466_s2 + $0x4e8] ss:$16 sps:$4 sm:$0xff]  }
  0x63   :  { %1348 = vmatpush1.bf16.msra.mxu0 %v5097_v37  ;;  %1520 = vmatpush1.bf16.msra.mxu1 %v5100_v38  ;;  %v5198_v37 = vld [vmem:[%s7466_s2 + $0x504] ss:$16 sps:$4 sm:$0xff]   ;;  %v5201_v38 = vld [vmem:[%s7466_s2 + $0x50c] ss:$16 sps:$4 sm:$0xff]  }
  0x64   :  { %1349 = vmatprep.subr.bf16.mxu0 %v5105_v39  ;;  %1521 = vmatprep.subr.bf16.mxu1 %v5108_v40  ;;  %v5196_v39 = vld [vmem:[%s7466_s2 + $0x500] ss:$16 sps:$4 sm:$0xff]   ;;  %v5199_v40 = vld [vmem:[%s7466_s2 + $0x508] ss:$16 sps:$4 sm:$0xff]  }
  0x67   :  { %1350 = vmatpush1.bf16.msra.mxu0 %v5103_v41  ;;  %1522 = vmatpush1.bf16.msra.mxu1 %v5106_v42  ;;  %v5204_v41 = vld [vmem:[%s7466_s2 + $0x524] ss:$16 sps:$4 sm:$0xff]   ;;  %v5207_v42 = vld [vmem:[%s7466_s2 + $0x52c] ss:$16 sps:$4 sm:$0xff]  }
  0x68   :  { %1351 = vmatprep.subr.bf16.mxu0 %v5111_v43  ;;  %1523 = vmatprep.subr.bf16.mxu1 %v5114_v44  ;;  %v5202_v43 = vld [vmem:[%s7466_s2 + $0x520] ss:$16 sps:$4 sm:$0xff]   ;;  %v5205_v44 = vld [vmem:[%s7466_s2 + $0x528] ss:$16 sps:$4 sm:$0xff]  }
  0x6b   :  { %1352 = vmatpush1.bf16.msra.mxu0 %v5109_v45  ;;  %1524 = vmatpush1.bf16.msra.mxu1 %v5112_v46  ;;  %v5210_v45 = vld [vmem:[%s7466_s2 + $0x544] ss:$16 sps:$4 sm:$0xff]   ;;  %v5213_v46 = vld [vmem:[%s7466_s2 + $0x54c] ss:$16 sps:$4 sm:$0xff]  }
  0x6c   :  { %1353 = vmatprep.subr.bf16.mxu0 %v5117_v47  ;;  %1525 = vmatprep.subr.bf16.mxu1 %v5120_v48  ;;  %v5208_v47 = vld [vmem:[%s7466_s2 + $0x540] ss:$16 sps:$4 sm:$0xff]   ;;  %v5211_v48 = vld [vmem:[%s7466_s2 + $0x548] ss:$16 sps:$4 sm:$0xff]  }
  0x6f   :  { %1354 = vmatpush1.bf16.msra.mxu0 %v5115_v49  ;;  %1526 = vmatpush1.bf16.msra.mxu1 %v5118_v50  ;;  %v5216_v49 = vld [vmem:[%s7466_s2 + $0x564] ss:$16 sps:$4 sm:$0xff]   ;;  %v5219_v50 = vld [vmem:[%s7466_s2 + $0x56c] ss:$16 sps:$4 sm:$0xff]  }
  0x70   :  { %1355 = vmatprep.subr.bf16.mxu0 %v5123_v51  ;;  %1527 = vmatprep.subr.bf16.mxu1 %v5126_v52  ;;  %v5214_v51 = vld [vmem:[%s7466_s2 + $0x560] ss:$16 sps:$4 sm:$0xff]   ;;  %v5217_v52 = vld [vmem:[%s7466_s2 + $0x568] ss:$16 sps:$4 sm:$0xff]  }
  0x73   :  { %1356 = vmatpush1.bf16.msra.mxu0 %v5121_v53  ;;  %1528 = vmatpush1.bf16.msra.mxu1 %v5124_v54  ;;  %v5222_v53 = vld [vmem:[%s7466_s2 + $0x584] ss:$16 sps:$4 sm:$0xff]   ;;  %v5225_v54 = vld [vmem:[%s7466_s2 + $0x58c] ss:$16 sps:$4 sm:$0xff]  }
  0x74   :  { %1357 = vmatprep.subr.bf16.mxu0 %v5129_v55  ;;  %1529 = vmatprep.subr.bf16.mxu1 %v5132_v56  ;;  %v5220_v55 = vld [vmem:[%s7466_s2 + $0x580] ss:$16 sps:$4 sm:$0xff]   ;;  %v5223_v56 = vld [vmem:[%s7466_s2 + $0x588] ss:$16 sps:$4 sm:$0xff]  }
  0x77   :  { %1358 = vmatpush1.bf16.msra.mxu0 %v5127_v57  ;;  %1530 = vmatpush1.bf16.msra.mxu1 %v5130_v58  ;;  %v5228_v57 = vld [vmem:[%s7466_s2 + $0x5a4] ss:$16 sps:$4 sm:$0xff]   ;;  %v5231_v58 = vld [vmem:[%s7466_s2 + $0x5ac] ss:$16 sps:$4 sm:$0xff]  }
  0x78   :  { %1359 = vmatprep.subr.bf16.mxu0 %v5135_v59  ;;  %1531 = vmatprep.subr.bf16.mxu1 %v5138_v60  ;;  %v5226_v59 = vld [vmem:[%s7466_s2 + $0x5a0] ss:$16 sps:$4 sm:$0xff]   ;;  %v5229_v60 = vld [vmem:[%s7466_s2 + $0x5a8] ss:$16 sps:$4 sm:$0xff]  }
  0x7b   :  { %1360 = vmatpush1.bf16.msra.mxu0 %v5133_v61  ;;  %1532 = vmatpush1.bf16.msra.mxu1 %v5136_v62  ;;  %v5234_v61 = vld [vmem:[%s7466_s2 + $0x5c4] ss:$16 sps:$4 sm:$0xff]   ;;  %v5237_v62 = vld [vmem:[%s7466_s2 + $0x5cc] ss:$16 sps:$4 sm:$0xff]  }
  0x7c   :  { %1361 = vmatprep.subr.bf16.mxu0 %v5141_v63  ;;  %1533 = vmatprep.subr.bf16.mxu1 %v5144_v0  ;;  %v5232_v63 = vld [vmem:[%s7466_s2 + $0x5c0] ss:$16 sps:$4 sm:$0xff]   ;;  %v5235_v0 = vld [vmem:[%s7466_s2 + $0x5c8] ss:$16 sps:$4 sm:$0xff]  }
  0x7f   :  { %1362 = vmatpush1.bf16.msra.mxu0 %v5139_v1  ;;  %1534 = vmatpush1.bf16.msra.mxu1 %v5142_v2  ;;  %v5240_v1 = vld [vmem:[%s7466_s2 + $0x5e4] ss:$16 sps:$4 sm:$0xff]   ;;  %v5243_v2 = vld [vmem:[%s7466_s2 + $0x5ec] ss:$16 sps:$4 sm:$0xff]  }
  0x80   :  { %1374 = vmatprep.subr.bf16.mxu0 %v5150_v3  ;;  %1546 = vmatprep.subr.bf16.mxu1 %v5153_v4  ;;  %v5238_v3 = vld [vmem:[%s7466_s2 + $0x5e0] ss:$16 sps:$4 sm:$0xff]   ;;  %v5241_v4 = vld [vmem:[%s7466_s2 + $0x5e8] ss:$16 sps:$4 sm:$0xff]  }
  0x82   :  { %1364 = vmatmul.mubr.bf16.vlgmr.msra.gmra.mrb[0].mxu0 %v5145_v5  ;;  %1536 = vmatmul.mubr.bf16.vlgmr.msra.gmra.mrb[0].mxu1 %v5145_v5  ;;  %v5249_v5 = vld [vmem:[%s7466_s2 + $0x604] ss:$16 sps:$4 sm:$0xff]  }
  0x83   :  { %1375 = vmatpush1.bf16.msra.mxu0 %v5148_v6  ;;  %1547 = vmatpush1.bf16.msra.mxu1 %v5151_v7  ;;  %v5252_v6 = vld [vmem:[%s7466_s2 + $0x60c] ss:$16 sps:$4 sm:$0xff]  }
  0x84   :  { %1376 = vmatprep.subr.bf16.mxu0 %v5156_v8  ;;  %1548 = vmatprep.subr.bf16.mxu1 %v5159_v9  ;;  %v5244_v7 = vld [vmem:[%s7464_s0 + $0x10] ss:$28 sps:$4 sm:$0xff]   ;;  %v1656_v8 = vld [vmem:[%s7468_s4 + $0x80] sm:$0xff] }
  0x85   :  { %1406 = vmatprep.mubr.bf16.mxu0 %v5246_v12  ;;  %1578 = vmatprep.mubr.bf16.mxu1 %v5246_v12  ;;  %v1657_v9 = vld [vmem:[%s7468_s4 + $0x88] sm:$0xff] }
  0x86   :  { %v4792_v12 = vpack.c.bf16 %v1657_v9, %v1656_v8 }
  0x87   :  { %1377 = vmatpush1.bf16.msra.mxu0 %v5154_v10  ;;  %1549 = vmatpush1.bf16.msra.mxu1 %v5157_v11  ;;  %v5247_v10 = vld [vmem:[%s7466_s2 + $0x600] ss:$16 sps:$4 sm:$0xff]   ;;  %v5250_v11 = vld [vmem:[%s7466_s2 + $0x608] ss:$16 sps:$4 sm:$0xff]  }
  0x88   :  { %1378 = vmatprep.subr.bf16.mxu0 %v5162_v13  ;;  %1550 = vmatprep.subr.bf16.mxu1 %v5165_v14  ;;  %v5682_v13 = vmov 0   ;;  %v1640_v14 = vld [vmem:[%s7468_s4] sm:$0xff] }
  0x8b   :  { %1379 = vmatpush1.bf16.msra.mxu0 %v5160_v15  ;;  %1551 = vmatpush1.bf16.msra.mxu1 %v5163_v16  ;;  %v1641_v15 = vld [vmem:[%s7468_s4 + $0x8] sm:$0xff]  ;;  %v1658_v16 = vld [vmem:[%s7468_s4 + $0x90] sm:$0xff] }
  0x8c   :  { %1380 = vmatprep.subr.bf16.mxu0 %v5168_v17  ;;  %1552 = vmatprep.subr.bf16.mxu1 %v5171_v18  ;;  %v1659_v17 = vld [vmem:[%s7468_s4 + $0x98] sm:$0xff] }
  0x8d   :  { %v5253_v18 = vld [vmem:[%s7464_s0 + $0x18] ss:$28 sps:$4 sm:$0xff]  }
  0x8f   :  { %1381 = vmatpush1.bf16.msra.mxu0 %v5166_v19  ;;  %1553 = vmatpush1.bf16.msra.mxu1 %v5169_v20  ;;  %v1642_v19 = vld [vmem:[%s7468_s4 + $0x10] sm:$0xff]  ;;  %v1643_v20 = vld [vmem:[%s7468_s4 + $0x18] sm:$0xff] }
  0x90   :  { %1382 = vmatprep.subr.bf16.mxu0 %v5174_v21  ;;  %1554 = vmatprep.subr.bf16.mxu1 %v5177_v22  ;;  %v4794_v21 = vpack.c.bf16 %v1641_v15, %v1640_v14  ;;  %v1660_v22 = vld [vmem:[%s7468_s4 + $0xa0] sm:$0xff] }
  0x93   :  { %1383 = vmatpush1.bf16.msra.mxu0 %v5172_v23  ;;  %1555 = vmatpush1.bf16.msra.mxu1 %v5175_v24  ;;  %v1661_v23 = vld [vmem:[%s7468_s4 + $0xa8] sm:$0xff]  ;;  %v4796_v24 = vpack.c.bf16 %v1659_v17, %v1658_v16 }
  0x94   :  { %1384 = vmatprep.subr.bf16.mxu0 %v5180_v25  ;;  %1556 = vmatprep.subr.bf16.mxu1 %v5183_v26  ;;  %v1644_v25 = vld [vmem:[%s7468_s4 + $0x20] sm:$0xff]  ;;  %v1645_v26 = vld [vmem:[%s7468_s4 + $0x28] sm:$0xff] }
  0x97   :  { %1385 = vmatpush1.bf16.msra.mxu0 %v5178_v27  ;;  %1557 = vmatpush1.bf16.msra.mxu1 %v5181_v28  ;;  %v4798_v27 = vpack.c.bf16 %v1643_v20, %v1642_v19  ;;  %v1662_v28 = vld [vmem:[%s7468_s4 + $0xb0] sm:$0xff] }
  0x98   :  { %1386 = vmatprep.subr.bf16.mxu0 %v5186_v29  ;;  %1558 = vmatprep.subr.bf16.mxu1 %v5189_v30  ;;  %v1663_v29 = vld [vmem:[%s7468_s4 + $0xb8] sm:$0xff]  ;;  %v4800_v30 = vpack.c.bf16 %v1661_v23, %v1660_v22 }
  0x9b   :  { %1387 = vmatpush1.bf16.msra.mxu0 %v5184_v31  ;;  %1559 = vmatpush1.bf16.msra.mxu1 %v5187_v32  ;;  %v1646_v31 = vld [vmem:[%s7468_s4 + $0x30] sm:$0xff]  ;;  %v1647_v32 = vld [vmem:[%s7468_s4 + $0x38] sm:$0xff] }
  0x9c   :  { %1388 = vmatprep.subr.bf16.mxu0 %v5192_v33  ;;  %1560 = vmatprep.subr.bf16.mxu1 %v5195_v34  ;;  %v4802_v33 = vpack.c.bf16 %v1645_v26, %v1644_v25  ;;  %v1664_v34 = vld [vmem:[%s7468_s4 + $0xc0] sm:$0xff] }
  0x9f   :  { %1389 = vmatpush1.bf16.msra.mxu0 %v5190_v35  ;;  %1561 = vmatpush1.bf16.msra.mxu1 %v5193_v36  ;;  %v1665_v35 = vld [vmem:[%s7468_s4 + $0xc8] sm:$0xff]  ;;  %v4804_v36 = vpack.c.bf16 %v1663_v29, %v1662_v28 }
  0xa0   :  { %1390 = vmatprep.subr.bf16.mxu0 %v5198_v37  ;;  %1562 = vmatprep.subr.bf16.mxu1 %v5201_v38  ;;  %v1648_v37 = vld [vmem:[%s7468_s4 + $0x40] sm:$0xff]  ;;  %v1649_v38 = vld [vmem:[%s7468_s4 + $0x48] sm:$0xff] }
  0xa3   :  { %1391 = vmatpush1.bf16.msra.mxu0 %v5196_v39  ;;  %1563 = vmatpush1.bf16.msra.mxu1 %v5199_v40  ;;  %v4806_v39 = vpack.c.bf16 %v1647_v32, %v1646_v31  ;;  %v1666_v40 = vld [vmem:[%s7468_s4 + $0xd0] sm:$0xff] }
  0xa4   :  { %1392 = vmatprep.subr.bf16.mxu0 %v5204_v41  ;;  %1564 = vmatprep.subr.bf16.mxu1 %v5207_v42  ;;  %v1667_v41 = vld [vmem:[%s7468_s4 + $0xd8] sm:$0xff]  ;;  %v4808_v42 = vpack.c.bf16 %v1665_v35, %v1664_v34 }
  0xa7   :  { %1393 = vmatpush1.bf16.msra.mxu0 %v5202_v43  ;;  %1565 = vmatpush1.bf16.msra.mxu1 %v5205_v44  ;;  %v1650_v43 = vld [vmem:[%s7468_s4 + $0x50] sm:$0xff]  ;;  %v1651_v44 = vld [vmem:[%s7468_s4 + $0x58] sm:$0xff] }
  0xa8   :  { %1394 = vmatprep.subr.bf16.mxu0 %v5210_v45  ;;  %1566 = vmatprep.subr.bf16.mxu1 %v5213_v46  ;;  %v4810_v45 = vpack.c.bf16 %v1649_v38, %v1648_v37  ;;  %v1668_v46 = vld [vmem:[%s7468_s4 + $0xe0] sm:$0xff] }
  0xab   :  { %1395 = vmatpush1.bf16.msra.mxu0 %v5208_v47  ;;  %1567 = vmatpush1.bf16.msra.mxu1 %v5211_v48  ;;  %v1669_v47 = vld [vmem:[%s7468_s4 + $0xe8] sm:$0xff]  ;;  %v4812_v48 = vpack.c.bf16 %v1667_v41, %v1666_v40 }
  0xac   :  { %1396 = vmatprep.subr.bf16.mxu0 %v5216_v49  ;;  %1568 = vmatprep.subr.bf16.mxu1 %v5219_v50  ;;  %v1652_v49 = vld [vmem:[%s7468_s4 + $0x60] sm:$0xff]  ;;  %v1653_v50 = vld [vmem:[%s7468_s4 + $0x68] sm:$0xff] }
  0xaf   :  { %1397 = vmatpush1.bf16.msra.mxu0 %v5214_v51  ;;  %1569 = vmatpush1.bf16.msra.mxu1 %v5217_v52  ;;  %v4814_v51 = vpack.c.bf16 %v1651_v44, %v1650_v43  ;;  %v4816_v52 = vpack.c.bf16 %v1669_v47, %v1668_v46 }
  0xb0   :  { %1398 = vmatprep.subr.bf16.mxu0 %v5222_v53  ;;  %1570 = vmatprep.subr.bf16.mxu1 %v5225_v54  ;;  %v4818_v53 = vpack.c.bf16 %v1653_v50, %v1652_v49 }
  0xb3   :  { %1399 = vmatpush1.bf16.msra.mxu0 %v5220_v55  ;;  %1571 = vmatpush1.bf16.msra.mxu1 %v5223_v56 }
  0xb4   :  { %1400 = vmatprep.subr.bf16.mxu0 %v5228_v57  ;;  %1572 = vmatprep.subr.bf16.mxu1 %v5231_v58 }
  0xb7   :  { %1401 = vmatpush1.bf16.msra.mxu0 %v5226_v59  ;;  %1573 = vmatpush1.bf16.msra.mxu1 %v5229_v60 }
  0xb8   :  { %1402 = vmatprep.subr.bf16.mxu0 %v5234_v61  ;;  %1574 = vmatprep.subr.bf16.mxu1 %v5237_v62 }
  0xbb   :  { %1403 = vmatpush1.bf16.msra.mxu0 %v5232_v63  ;;  %1575 = vmatpush1.bf16.msra.mxu1 %v5235_v0 }
  0xbc   :  { %1404 = vmatprep.subr.bf16.mxu0 %v5240_v1  ;;  %1576 = vmatprep.subr.bf16.mxu1 %v5243_v2 }
  0xbf   :  { %1405 = vmatpush1.bf16.msra.mxu0 %v5238_v3  ;;  %1577 = vmatpush1.bf16.msra.mxu1 %v5241_v4 }
  0xc0   :  { %1417 = vmatprep.subr.bf16.mxu0 %v5249_v5  ;;  %1589 = vmatprep.subr.bf16.mxu1 %v5252_v6 }
  0xc2   :  { %1407 = vmatmul.mubr.bf16.vlgmr.msra.gmra.mrb[0].mxu0 %v5244_v7  ;;  %1579 = vmatmul.mubr.bf16.vlgmr.msra.gmra.mrb[0].mxu1 %v5244_v7 }
  0xc3   :  { %1418 = vmatpush1.bf16.msra.mxu0 %v5247_v10  ;;  %1590 = vmatpush1.bf16.msra.mxu1 %v5250_v11 }
  0xc4   :  { %1449 = vmatprep.mubr.bf16.mxu0 %v5682_v13  ;;  %1621 = vmatprep.mubr.bf16.mxu1 %v5682_v13 }
  0xc5   :  { %4793 = vmatprep.subr.bf16.mxu1 %v4792_v12 }
  0xce   :  { %4415 = vmatmul.mubr.msk.bf16.vlgmr.msra.gmra.mrb[0].mxu0 %vm1284_vm0, %v5253_v18  ;;  %4416 = vmatmul.mubr.msk.bf16.vlgmr.msra.gmra.mrb[0].mxu1 %vm1284_vm0, %v5253_v18 }
  0xcf   :  { %4795 = vmatpush3.bf16.msra.mxu1 %v4794_v21 }
  0xd0   :  { %4797 = vmatprep.subr.bf16.mxu1 %v4796_v24 }
  0xd3   :  { %4799 = vmatpush3.bf16.msra.mxu1 %v4798_v27 }
  0xd4   :  { %4801 = vmatprep.subr.bf16.mxu1 %v4800_v30 }
  0xd7   :  { %4803 = vmatpush3.bf16.msra.mxu1 %v4802_v33 }
  0xd8   :  { %4805 = vmatprep.subr.bf16.mxu1 %v4804_v36 }
  0xdb   :  { %4807 = vmatpush3.bf16.msra.mxu1 %v4806_v39 }
  0xdc   :  { %4809 = vmatprep.subr.bf16.mxu1 %v4808_v42 }
  0xdf   :  { %4811 = vmatpush3.bf16.msra.mxu1 %v4810_v45 }
  0xe0   :  { %4813 = vmatprep.subr.bf16.mxu1 %v4812_v48 }
  0xe3   :  { %4815 = vmatpush3.bf16.msra.mxu1 %v4814_v51 }
  0xe4   :  { %4817 = vmatprep.subr.bf16.mxu1 %v4816_v52 }
  0xe5   :  { %19 = vsyncpa [#allocation5], 0  ;;  %v1670_v54 = vld [vmem:[%s7468_s4 + $0xf0] sm:$0xff]  ;;  %v1671_v55 = vld [vmem:[%s7468_s4 + $0xf8] sm:$0xff]  ;;  %v249_v63 = vlaneseq  ;;  %vm1912_vm1 = vcmask 1043456   ;;  %vm5684_vm2 = vmmov 1  }
  0xe6   :  { %v4820_v56 = vpack.c.bf16 %v1671_v55, %v1670_v54  ;;  %v1654_v57 = vld [vmem:[%s7468_s4 + $0x70] sm:$0xff]  ;;  %v1655_v58 = vld [vmem:[%s7468_s4 + $0x78] sm:$0xff]  ;;  %v1688_v60 = vld [vmem:[%s7468_s4 + $0x180] sm:$0xff]  ;;  %vm1907_vm4 = vcmask 97280   ;;  %vm4177_vm5 = vcmask 326656   ;;  %vm2079_vm6 = vcmask 162816  }
  0xe7   :  { %4819 = vmatpush3.bf16.msra.mxu1 %v4818_v53  ;;  %v4822_v59 = vpack.c.bf16 %v1655_v58, %v1654_v57  ;;  %v1689_v61 = vld [vmem:[%s7468_s4 + $0x188] sm:$0xff]  ;;  %v6470_v0 = vshrl.u32 %v249_v63, 7  ;;  %v6478_v2 = vld [vmem:[%s7467_s3] sm:$0xf]  ;;  %v1690_v18 = vld [vmem:[%s7468_s4 + $0x190] sm:$0xff]  ;;  %s5683_s3 = smov 108  }
  0xe8   :  { %4821 = vmatprep.subr.bf16.mxu1 %v4820_v56  ;;  %v4824_v62 = vpack.c.bf16 %v1689_v61, %v1688_v60  ;;  %v1672_v12 = vld [vmem:[%s7468_s4 + $0x100] sm:$0xff]  ;;  %v1673_v13 = vld [vmem:[%s7468_s4 + $0x108] sm:$0xff]  ;;  %v1691_v19 = vld [vmem:[%s7468_s4 + $0x198] sm:$0xff] }
  0xe9   :  { %v6473_v1 = vsub.s32 0, %v6470_v0  ;;  %v6481_v3 = vsub.s32 1, %v6470_v0  ;;  %v6488_v6 = vsub.s32 3, %v6470_v0  ;;  %v4826_v24 = vpack.c.bf16 %v1673_v13, %v1672_v12  ;;  %v1674_v28 = vld [vmem:[%s7468_s4 + $0x110] sm:$0xff]  ;;  %v1675_v29 = vld [vmem:[%s7468_s4 + $0x118] sm:$0xff]  ;;  %v1692_v32 = vld [vmem:[%s7468_s4 + $0x1a0] sm:$0xff] }
  0xea   :  { %v4828_v27 = vpack.c.bf16 %v1691_v19, %v1690_v18  ;;  %v1693_v33 = vld [vmem:[%s7468_s4 + $0x1a8] sm:$0xff]  ;;  %v4830_v34 = vpack.c.bf16 %v1675_v29, %v1674_v28  ;;  %v1676_v37 = vld [vmem:[%s7468_s4 + $0x120] sm:$0xff]  ;;  %v1694_v40 = vld [vmem:[%s7468_s4 + $0x1b0] sm:$0xff]  ;;  %v6574_v61 = vsub.s32 2, %v6470_v0 }
  0xeb   :  { %4823 = vmatpush3.bf16.msra.mxu1 %v4822_v59  ;;  %v252_v4 = vrot.slane %v6478_v2, %v6473_v1  ;;  %v256_v5 = vrot.slane %v6478_v2, %v6481_v3  ;;  %v6500_v15 = vrot.slane %v6478_v2, %v6488_v6  ;;  %v4832_v36 = vpack.c.bf16 %v1693_v33, %v1692_v32  ;;  %v1677_v38 = vld [vmem:[%s7468_s4 + $0x128] sm:$0xff]  ;;  %v1695_v41 = vld [vmem:[%s7468_s4 + $0x1b8] sm:$0xff]  ;;  %v1678_v44 = vld [vmem:[%s7468_s4 + $0x130] sm:$0xff] }
  0xec   :  { %4825 = vmatprep.subr.bf16.mxu1 %v4824_v62  ;;  %v4834_v42 = vpack.c.bf16 %v1677_v38, %v1676_v37  ;;  %v4836_v43 = vpack.c.bf16 %v1695_v41, %v1694_v40  ;;  %v1679_v45 = vld [vmem:[%s7468_s4 + $0x138] sm:$0xff]  ;;  %v1696_v46 = vld [vmem:[%s7468_s4 + $0x1c0] sm:$0xff]  ;;  %v1697_v47 = vld [vmem:[%s7468_s4 + $0x1c8] sm:$0xff]  ;;  %v5685_v32 = vmov 0.0  }
  0xed   :  { %v4838_v48 = vpack.c.bf16 %v1679_v45, %v1678_v44  ;;  %v4840_v49 = vpack.c.bf16 %v1697_v47, %v1696_v46  ;;  %v1680_v50 = vld [vmem:[%s7468_s4 + $0x140] sm:$0xff]  ;;  %v1681_v51 = vld [vmem:[%s7468_s4 + $0x148] sm:$0xff]  ;;  %v1698_v52 = vld [vmem:[%s7468_s4 + $0x1d0] sm:$0xff]  ;;  %1989 = vmatprep.mubr.f32.mxu0 %v5685_v32 }
  0xee   :  { %v1699_v53 = vld [vmem:[%s7468_s4 + $0x1d8] sm:$0xff]  ;;  %v4842_v54 = vpack.c.bf16 %v1681_v51, %v1680_v50  ;;  %v1682_v56 = vld [vmem:[%s7468_s4 + $0x150] sm:$0xff]  ;;  %v1700_v58 = vld [vmem:[%s7468_s4 + $0x1e0] sm:$0xff] }
  0xef   :  { %v4844_v55 = vpack.c.bf16 %v1699_v53, %v1698_v52  ;;  %v1683_v57 = vld [vmem:[%s7468_s4 + $0x158] sm:$0xff]  ;;  %v1701_v59 = vld [vmem:[%s7468_s4 + $0x1e8] sm:$0xff]  ;;  %v1684_v63 = vld [vmem:[%s7468_s4 + $0x160] sm:$0xff] }
  0xf0   :  { %v4846_v60 = vpack.c.bf16 %v1683_v57, %v1682_v56  ;;  %v4848_v62 = vpack.c.bf16 %v1701_v59, %v1700_v58  ;;  %v1686_v12 = vld [vmem:[%s7468_s4 + $0x170] sm:$0xff]  ;;  %v1687_v13 = vld [vmem:[%s7468_s4 + $0x178] sm:$0xff]  ;;  %vm6624_vm3 = vmpackc.low %vm1912_vm1, %vm5684_vm2 }
  0xf1   :  { %v1900_v29 = vld [vmem:[%s7471_s7 + $0x38] sm:$0xf]  ;;  %v1881_v47 = vld [vmem:[%s7470_s6] sm:$0xff]  ;;  %v1887_v50 = vld [vmem:[%s7470_s6 + $0x30] sm:$0xff] }
  0xf2   :  { %v1884_v38 = vld [vmem:[%s7470_s6 + $0x18] sm:$0xff]  ;;  %v4417_v51 = vld [vmem:[%s7469_s5] ss:$0 sm:$0xff] }
 0x1a1   :  { %v1451_v7 = vpop.f32.mrb[0].mxu0  ;;  %v6490_v8 = vpop.f32.mrb[0].mxu1 }
 0x1a2   :  { %v4876_v9 = vadd.f32 %v1451_v7, %v252_v4  ;;  %v1453_v10 = vpop.f32.mrb[1].mxu0  ;;  %v1625_v11 = vpop.f32.mrb[1].mxu1  ;;  %v1703_v7 = vld [vmem:[%s7468_s4 + $0x1f8] sm:$0xff] }
 0x1a3   :  { %v4877_v14 = vadd.f32 %v1453_v10, %v256_v5  ;;  %v1455_v16 = vpop.f32.mrb[2].mxu0  ;;  %v6502_v17 = vpop.f32.mrb[2].mxu1  ;;  %v4881_v30 = vadd.f32 %v1625_v11, %v6500_v15  ;;  %v260_v10 = vrot.slane %v6478_v2, %v6574_v61 }
 0x1a4   :  { %v1457_v20 = vpop.f32.mrb[3].mxu0  ;;  %v6510_v21 = vpop.f32.mrb[3].mxu1  ;;  %v1632_v25 = vmax.f32 %v4876_v9, 0.0  ;;  %v4878_v26 = vadd.f32 %v1455_v16, %v252_v4  ;;  %v1685_v4 = vld [vmem:[%s7468_s4 + $0x168] sm:$0xff] }
 0x1a5   :  { %v1633_v22 = vmax.f32 %v4877_v14, 0.0  ;;  %v4879_v23 = vadd.f32 %v1457_v20, %v256_v5  ;;  %v1635_v39 = vmax.f32 %v4881_v30, 0.0  ;;  %v1702_v5 = vld [vmem:[%s7468_s4 + $0x1f0] sm:$0xff]  ;;  %v4850_v9 = vpack.c.bf16 %v1685_v4, %v1684_v63 }
 0x1a6   :  { %v1636_v35 = vmax.f32 %v4878_v26, 0.0  ;;  %v4852_v11 = vpack.c.bf16 %v1703_v7, %v1702_v5  ;;  %v4854_v14 = vpack.c.bf16 %v1687_v13, %v1686_v12  ;;  %v4880_v16 = vadd.f32 %v6490_v8, %v260_v10  ;;  %v6608_v8 = vld [vmem:[%s7465_s1 + $0x8] sm:$0xff]  ;;  %v1897_v26 = vld [vmem:[%s7471_s7 + $0x20] sm:$0xf]  ;;  %v1895_v30 = vld [vmem:[%s7471_s7 + $0x10] sm:$0xff] }
 0x1a7   :  { %v1637_v31 = vmax.f32 %v4879_v23, 0.0  ;;  %1775 = vmatprep.mubr.f32.mxu1 %v1633_v22  ;;  %v4883_v18 = vadd.f32 %v6510_v21, %v6500_v15  ;;  %v4882_v19 = vadd.f32 %v6502_v17, %v260_v10  ;;  %v6603_v23 = vld [vmem:[%s7465_s1] sm:$0xff]  ;;  %1905 = vrot.lane.b32.xlu1 %v6608_v8, %s5683_s3  ;;  %v1894_v15 = vld [vmem:[%s7471_s7 + $0x8] sm:$0xff]  ;;  %v1892_v12 = vld [vmem:[%s7470_s6 + $0x58] sm:$0xf] }
 0x1a8   :  { %1776 = vmatmul.mubr.f32.vlgmr.msra.gmra.mrb[4].mxu1 %v1632_v25  ;;  %v1634_v2 = vmax.f32 %v4880_v16, 0.0  ;;  %1903 = vrot.lane.b32.xlu0 %v6603_v23, %s5683_s3  ;;  %v1898_v17 = vld [vmem:[%s7471_s7 + $0x28] sm:$0xf]  ;;  %v1893_v21 = vld [vmem:[%s7471_s7] sm:$0xff]  ;;  %v1891_v16 = vld [vmem:[%s7470_s6 + $0x50] sm:$0xf] }
 0x1a9   :  { %4827 = vmatpush3.bf16.msra.mxu1 %v4826_v24  ;;  %1780 = vmatprep.mubr.f32.mxu1 %v1637_v31  ;;  %v1639_v20 = vmax.f32 %v4883_v18, 0.0  ;;  %v1638_v22 = vmax.f32 %v4882_v19, 0.0  ;;  %v4856_v24 = vpack.c.bf16 %v1898_v17, %v1894_v15  ;;  %v4859_v28 = vpack.c.bf16 %v1897_v26, %v1893_v21  ;;  %v1899_v31 = vld [vmem:[%s7471_s7 + $0x30] sm:$0xf]  ;;  %v5259_v19 = vld [vmem:[%s7473_s9 + $0xc] ss:$28 sps:$4 sm:$0xff]  }
 0x1aa   :  { %4829 = vmatprep.subr.bf16.mxu1 %v4828_v27  ;;  %v1896_v27 = vld [vmem:[%s7471_s7 + $0x18] sm:$0xff]  ;;  %v5257_v25 = vld [vmem:[%s7473_s9 + $0x8] ss:$28 sps:$4 sm:$0xff]  }
 0x1ab   :  { %4858 = vmatprep.subr.msk.bf16.mxu0 %vm6624_vm3, %v4856_v24  ;;  %v4862_v33 = vpack.c.bf16 %v1900_v29, %v1896_v27  ;;  %v5254_v24 = vld [vmem:[%s7473_s9] ss:$28 sps:$4 sm:$0xff]  }
 0x1ac   :  { %1781 = vmatmul.mubr.f32.gmra.mrb[6].mxu1 %v1636_v35  ;;  %v1882_v35 = vld [vmem:[%s7470_s6 + $0x8] sm:$0xff]  ;;  %4861 = vmatpush1.bf16.msk.msra.mxu0 %vm6624_vm3, %v4859_v28  ;;  %v5262_v27 = vld [vmem:[%s7473_s9 + $0x3c] ss:$28 sps:$4 sm:$0xff]   ;;  %v5265_v28 = vld [vmem:[%s7473_s9 + $0x44] ss:$28 sps:$4 sm:$0xff]  }
 0x1ad   :  { %4831 = vmatpush3.bf16.msra.mxu1 %v4830_v34  ;;  %1850 = vmatprep.mubr.f32.mxu1 %v1635_v39  ;;  %v4865_v34 = vpack.c.bf16 %v1899_v31, %v1895_v30  ;;  %v1888_v39 = vld [vmem:[%s7470_s6 + $0x38] sm:$0xff] }
 0x1ae   :  { %4833 = vmatprep.subr.bf16.mxu1 %v4832_v36  ;;  %v1886_v36 = vld [vmem:[%s7470_s6 + $0x28] sm:$0xff]  ;;  %v4872_v40 = vpack.c.bf16 %v1888_v39, %v1884_v38  ;;  %v5260_v30 = vld [vmem:[%s7473_s9 + $0x38] ss:$28 sps:$4 sm:$0xff]   ;;  %v5263_v31 = vld [vmem:[%s7473_s9 + $0x40] ss:$28 sps:$4 sm:$0xff]  }
 0x1af   :  { %v4868_v37 = vpack.c.bf16 %v1886_v36, %v1882_v35  ;;  %v5274_v35 = vld [vmem:[%s7473_s9 + $0xac] ss:$28 sps:$4 sm:$0xff]   ;;  %v5277_v36 = vld [vmem:[%s7473_s9 + $0xb4] ss:$28 sps:$4 sm:$0xff]   ;;  %v5280_v39 = vld [vmem:[%s7473_s9 + $0xe4] ss:$28 sps:$4 sm:$0xff]  }
 0x1b0   :  { %v5275_v38 = vld [vmem:[%s7473_s9 + $0xb0] ss:$28 sps:$4 sm:$0xff]  }
 0x1b1   :  { %4835 = vmatpush3.bf16.msra.mxu1 %v4834_v42  ;;  %4869 = vmatprep.subr.bf16.mxu0 %v4868_v37  ;;  %v5272_v37 = vld [vmem:[%s7473_s9 + $0xa8] ss:$28 sps:$4 sm:$0xff]  }
 0x1b2   :  { %4837 = vmatprep.subr.bf16.mxu1 %v4836_v43 }
 0x1b5   :  { %4839 = vmatpush3.bf16.msra.mxu1 %v4838_v48  ;;  %v1885_v48 = vld [vmem:[%s7470_s6 + $0x20] sm:$0xff] }
 0x1b6   :  { %4841 = vmatprep.subr.bf16.mxu1 %v4840_v49  ;;  %v1883_v49 = vld [vmem:[%s7470_s6 + $0x10] sm:$0xff]  ;;  %v4870_v52 = vpack.c.bf16 %v1885_v48, %v1881_v47  ;;  %v5295_v48 = vld [vmem:[%s7473_s9 + $0x15c] ss:$28 sps:$4 sm:$0xff]  }
 0x1b7   :  { %v5292_v47 = vld [vmem:[%s7473_s9 + $0x154] ss:$28 sps:$4 sm:$0xff]  }
 0x1b9   :  { %4843 = vmatpush3.bf16.msra.mxu1 %v4842_v54  ;;  %v4874_v54 = vpack.c.bf16 %v1887_v50, %v1883_v49  ;;  %v5290_v49 = vld [vmem:[%s7473_s9 + $0x150] ss:$28 sps:$4 sm:$0xff]   ;;  %v5293_v50 = vld [vmem:[%s7473_s9 + $0x158] ss:$28 sps:$4 sm:$0xff]  }
 0x1ba   :  { %4845 = vmatprep.subr.bf16.mxu1 %v4844_v55 }
 0x1bd   :  { %4847 = vmatpush3.bf16.msra.mxu1 %v4846_v60 }
 0x1be   :  { %4849 = vmatprep.subr.bf16.mxu1 %v4848_v62 }
 0x1c1   :  { %4851 = vmatpush3.bf16.msra.mxu1 %v4850_v9 }
 0x1c2   :  { %4853 = vmatprep.subr.bf16.mxu1 %v4852_v11  ;;  %v1890_v11 = vld [vmem:[%s7470_s6 + $0x48] sm:$0xf] }
 0x1c5   :  { %4855 = vmatpush3.bf16.msra.mxu1 %v4854_v14  ;;  %v1889_v14 = vld [vmem:[%s7470_s6 + $0x40] sm:$0xf] }
 0x1c6   :  { %4864 = vmatprep.subr.msk.bf16.mxu1 %vm6624_vm3, %v4862_v33  ;;  %v5266_v33 = vld [vmem:[%s7473_s9 + $0x70] ss:$28 sps:$4 sm:$0xff]  }
 0x1c8   :  { %1851 = vmatmul.mubr.f32.vlgmr.msra.gmra.mrb[8].mxu1 %v1634_v2  ;;  %v5256_v2 = vld [vmem:[%s7473_s9 + $0x4] ss:$28 sps:$4 sm:$0xff]  }
 0x1c9   :  { %1855 = vmatprep.mubr.f32.mxu1 %v1639_v20  ;;  %4867 = vmatpush1.bf16.msk.msra.mxu1 %vm6624_vm3, %v4865_v34  ;;  %v5269_v34 = vld [vmem:[%s7473_s9 + $0x78] ss:$28 sps:$4 sm:$0xff]  }
 0x1ca   :  { %4873 = vmatprep.subr.bf16.mxu1 %v4872_v40  ;;  %v5283_v40 = vld [vmem:[%s7473_s9 + $0xec] ss:$28 sps:$4 sm:$0xff]  }
 0x1cc   :  { %1856 = vmatmul.mubr.f32.gmra.mrb[10].mxu1 %v1638_v22 }
 0x1cd   :  { %2066 = vmatprep.mubr.f32.mxu1 %v5685_v32 }
 0x219   :  { %v1906_v59 = vpop.permute.xlu1 %1905 }
 0x21a   :  { %v1904_v56 = vpop.permute.xlu0 %1903 }
 0x21b   :  { %4420 = vmatmul.mubr.msk.f32.vlgmr.msra.gmra.mrb[4].mxu0 %vm1907_vm4, %v1904_v56  ;;  %4424 = vmatmul.mubr.msk.f32.vlgmr.msra.gmra.mrb[12].mxu1 %vm1907_vm4, %v1904_v56  ;;  %v5307_v56 = vld [vmem:[%s7473_s9 + $0x1cc] ss:$28 sps:$4 sm:$0xff]  }
 0x21c   :  { %4871 = vmatpush1.bf16.msra.mxu0 %v4870_v52  ;;  %1995 = vmatprep.mubr.f32.mxu0 %v5685_v32  ;;  %v5301_v52 = vld [vmem:[%s7473_s9 + $0x194] ss:$28 sps:$4 sm:$0xff]  }
 0x21d   :  { %2072 = vmatprep.mubr.f32.mxu1 %v5685_v32  ;;  %4875 = vmatpush1.bf16.msra.mxu1 %v4874_v54  ;;  %v5299_v54 = vld [vmem:[%s7473_s9 + $0x190] ss:$28 sps:$4 sm:$0xff]  }
 0x21e   :  { %4426 = vmatprep.subr.msk.mxu0 %vm1912_vm1, %v1890_v11  ;;  %4430 = vmatprep.subr.msk.mxu1 %vm1912_vm1, %v1892_v12  ;;  %v5325_v11 = vld [vmem:[%s7473_s9 + $0x274] ss:$28 sps:$4 sm:$0xff]   ;;  %v5320_v12 = vld [vmem:[%s7473_s9 + $0x268] ss:$28 sps:$4 sm:$0xff]  }
 0x21f   :  { %4421 = vmatmul.mubr.msk.f32.gmra.mrb[6].mxu0 %vm1907_vm4, %v1906_v59  ;;  %4425 = vmatmul.mubr.msk.f32.gmra.mrb[14].mxu1 %vm1907_vm4, %v1906_v59  ;;  %v5310_v59 = vld [vmem:[%s7473_s9 + $0x1fc] ss:$28 sps:$4 sm:$0xff]  }
 0x220   :  { %2162 = vmatprep.mubr.f32.mxu0 %v5685_v32  ;;  %2239 = vmatprep.mubr.f32.mxu1 %v5685_v32 }
 0x221   :  { %4427 = vmatpush1.msk.msra.mxu0 %vm1912_vm1, %v1889_v14  ;;  %4431 = vmatpush1.msk.msra.mxu1 %vm1912_vm1, %v1891_v16  ;;  %v5328_v14 = vld [vmem:[%s7473_s9 + $0x2a4] ss:$28 sps:$4 sm:$0xff]   ;;  %v5331_v16 = vld [vmem:[%s7473_s9 + $0x2ac] ss:$28 sps:$4 sm:$0xff]  }
 0x222   :  { %3739 = vmatprep.subr.bf16.mxu0 %v5256_v2  ;;  %3825 = vmatprep.subr.bf16.mxu1 %v5259_v19  ;;  %v5329_v2 = vld [vmem:[%s7473_s9 + $0x2a8] ss:$28 sps:$4 sm:$0xff]   ;;  %v5334_v19 = vld [vmem:[%s7473_s9 + $0x2dc] ss:$28 sps:$4 sm:$0xff]  }
 0x27b   :  { %v4704_v41 = vpop.f32.mrb[4].mxu1 }
 0x27c   :  { %v4705_v42 = vpop.f32.mrb[5].mxu1 }
 0x27d   :  { %v4706_v43 = vadd.f32 %v4705_v42, %v4704_v41  ;;  %v5278_v41 = vld [vmem:[%s7473_s9 + $0xe0] ss:$28 sps:$4 sm:$0xff]   ;;  %v5281_v42 = vld [vmem:[%s7473_s9 + $0xe8] ss:$28 sps:$4 sm:$0xff]  }
 0x27f   :  { %v4707_v44 = vpop.f32.mrb[6].mxu1  ;;  %v1778_v57 = vadd.f32 %v4706_v43, %v4417_v51  ;;  %v5286_v43 = vld [vmem:[%s7473_s9 + $0x11c] ss:$28 sps:$4 sm:$0xff]  }
 0x280   :  { %v4708_v45 = vpop.f32.mrb[7].mxu1 }
 0x281   :  { %v4709_v46 = vadd.f32 %v4708_v45, %v4707_v44  ;;  %v5289_v44 = vld [vmem:[%s7473_s9 + $0x124] ss:$28 sps:$4 sm:$0xff]   ;;  %v5284_v45 = vld [vmem:[%s7473_s9 + $0x118] ss:$28 sps:$4 sm:$0xff]  }
 0x283   :  { %v1783_v4 = vadd.f32 %v4709_v46, %v4417_v51  ;;  %v5287_v46 = vld [vmem:[%s7473_s9 + $0x120] ss:$28 sps:$4 sm:$0xff]   ;;  %v5298_v51 = vld [vmem:[%s7473_s9 + $0x18c] ss:$28 sps:$4 sm:$0xff]  }
 0x29b   :  { %v4742_v53 = vpop.f32.mrb[8].mxu1 }
 0x29c   :  { %v4743_v55 = vpop.f32.mrb[9].mxu1 }
 0x29d   :  { %v4744_v58 = vadd.f32 %v4743_v55, %v4742_v53  ;;  %v5296_v53 = vld [vmem:[%s7473_s9 + $0x188] ss:$28 sps:$4 sm:$0xff]  }
 0x29e   :  { %v5304_v55 = vld [vmem:[%s7473_s9 + $0x1c4] ss:$28 sps:$4 sm:$0xff]  }
 0x29f   :  { %v1853_v60 = vadd.f32 %v4744_v58, %v1778_v57  ;;  %v4745_v62 = vpop.f32.mrb[10].mxu1  ;;  %v5302_v57 = vld [vmem:[%s7473_s9 + $0x1c0] ss:$28 sps:$4 sm:$0xff]   ;;  %v5305_v58 = vld [vmem:[%s7473_s9 + $0x1c8] ss:$28 sps:$4 sm:$0xff]  }
 0x2a0   :  { %v4746_v63 = vpop.f32.mrb[11].mxu1 }
 0x2a1   :  { %v1863_v5 = vmul.f32 0.5, %v1853_v60  ;;  %4178 = vst.msk [vmem:[#allocation4] sm:$0xff] %vm4177_vm5, %v1853_v60  ;;  %v4747_v7 = vadd.f32 %v4746_v63, %v4745_v62  ;;  %v5308_v62 = vld [vmem:[%s7473_s9 + $0x1f8] ss:$28 sps:$4 sm:$0xff]   ;;  %v5311_v63 = vld [vmem:[%s7473_s9 + $0x200] ss:$28 sps:$4 sm:$0xff]  }
 0x2a3   :  { %v1865_v9 = vmul.f32 1.442695, %v1863_v5  ;;  %v1858_v10 = vadd.f32 %v4747_v7, %v1783_v4  ;;  %v5316_v4 = vld [vmem:[%s7473_s9 + $0x234] ss:$28 sps:$4 sm:$0xff]   ;;  %v5319_v5 = vld [vmem:[%s7473_s9 + $0x23c] ss:$28 sps:$4 sm:$0xff]  }
 0x2a4   :  { %v5314_v7 = vld [vmem:[%s7473_s9 + $0x230] ss:$28 sps:$4 sm:$0xff]  }
 0x2a5   :  { %5574 = vpow2.f32 %v1865_v9  ;;  %v1864_v13 = vmul.f32 0.5, %v1858_v10  ;;  %4179 = vst.msk [vmem:[#allocation4 + $0x8] sm:$0xff] %vm4177_vm5, %v1858_v10  ;;  %v5317_v9 = vld [vmem:[%s7473_s9 + $0x238] ss:$28 sps:$4 sm:$0xff]  }
 0x2a7   :  { %v1867_v18 = vmul.f32 1.442695, %v1864_v13  ;;  %v5323_v13 = vld [vmem:[%s7473_s9 + $0x270] ss:$28 sps:$4 sm:$0xff]  }
 0x2a9   :  { %5576 = vpow2.f32 %v1867_v18  ;;  %v5326_v18 = vld [vmem:[%s7473_s9 + $0x2a0] ss:$28 sps:$4 sm:$0xff]  }
 0x2af   :  { %v5575_v20 = vpop.eup %5574 }
 0x2b0   :  { %1871 = vrot.lane.b32.xlu0 %v5575_v20, %s5683_s3  ;;  %v5337_v20 = vld [vmem:[%s7473_s9 + $0x2e4] ss:$28 sps:$4 sm:$0xff]  }
 0x2b3   :  { %v5577_v22 = vpop.eup %5576 }
 0x2b4   :  { %1873 = vrot.lane.b32.xlu1 %v5577_v22, %s5683_s3  ;;  %v5332_v22 = vld [vmem:[%s7473_s9 + $0x2d8] ss:$28 sps:$4 sm:$0xff]  }
 0x322   :  { %v1872_v15 = vpop.permute.xlu0 %1871 }
 0x323   :  { %v1877_v17 = vmul.f32 %v1872_v15, %v6603_v23  ;;  %v5335_v15 = vld [vmem:[%s7473_s9 + $0x2e0] ss:$28 sps:$4 sm:$0xff]  }
 0x325   :  { %v1879_v21 = vadd.f32 %v1877_v17, %v1853_v60  ;;  %v5313_v60 = vld [vmem:[%s7473_s9 + $0x204] ss:$28 sps:$4 sm:$0xff]   ;;  %v5340_v17 = vld [vmem:[%s7473_s9 + $0x314] ss:$28 sps:$4 sm:$0xff]  }
 0x326   :  { %v1874_v26 = vpop.permute.xlu1 %1873 }
 0x327   :  { %v1878_v23 = vmul.f32 %v1874_v26, %v6608_v8  ;;  %4428 = vmatmul.mubr.msk.f32.vlgmr.msra.gmra.mrb[4].mxu0 %vm2079_vm6, %v1879_v21  ;;  %4432 = vmatmul.mubr.msk.f32.vlgmr.msra.gmra.mrb[12].mxu1 %vm2079_vm6, %v1879_v21  ;;  %v5268_v8 = vld [vmem:[%s7473_s9 + $0x74] ss:$28 sps:$4 sm:$0xff]   ;;  %v5343_v21 = vld [vmem:[%s7473_s9 + $0x31c] ss:$28 sps:$4 sm:$0xff]   ;;  %v5346_v26 = vld [vmem:[%s7473_s9 + $0x34c] ss:$28 sps:$4 sm:$0xff]  }
 0x328   :  { %2168 = vmatprep.mubr.f32.mxu0 %v5685_v32  ;;  %2245 = vmatprep.mubr.f32.mxu1 %v5685_v32  ;;  %v5271_v32 = vld [vmem:[%s7473_s9 + $0x7c] ss:$28 sps:$4 sm:$0xff]  }
 0x329   :  { %v1880_v29 = vadd.f32 %v1878_v23, %v1858_v10  ;;  %3740 = vmatpush1.bf16.msra.mxu0 %v5254_v24  ;;  %3826 = vmatpush1.bf16.msra.mxu1 %v5257_v25  ;;  %v5322_v10 = vld [vmem:[%s7473_s9 + $0x26c] ss:$28 sps:$4 sm:$0xff]   ;;  %v5341_v25 = vld [vmem:[%s7473_s9 + $0x318] ss:$28 sps:$4 sm:$0xff]  }
 0x32a   :  { %3741 = vmatprep.subr.bf16.mxu0 %v5262_v27  ;;  %3827 = vmatprep.subr.bf16.mxu1 %v5265_v28  ;;  %v5338_v24 = vld [vmem:[%s7473_s9 + $0x310] ss:$28 sps:$4 sm:$0xff]   ;;  %v5344_v28 = vld [vmem:[%s7473_s9 + $0x348] ss:$28 sps:$4 sm:$0xff]  }
 0x32b   :  { %4429 = vmatmul.mubr.msk.f32.gmra.mrb[6].mxu0 %vm2079_vm6, %v1880_v29  ;;  %4433 = vmatmul.mubr.msk.f32.gmra.mrb[14].mxu1 %vm2079_vm6, %v1880_v29  ;;  %v5349_v27 = vld [vmem:[%s7473_s9 + $0x354] ss:$28 sps:$4 sm:$0xff]   ;;  %v5352_v29 = vld [vmem:[%s7473_s9 + $0x384] ss:$28 sps:$4 sm:$0xff]  }
 0x32c   :  { %v5347_v23 = vld [vmem:[%s7473_s9 + $0x350] ss:$28 sps:$4 sm:$0xff]  }
 0x32d   :  { %3742 = vmatpush1.bf16.msra.mxu0 %v5260_v30  ;;  %3828 = vmatpush1.bf16.msra.mxu1 %v5263_v31  ;;  %v5355_v30 = vld [vmem:[%s7473_s9 + $0x38c] ss:$28 sps:$4 sm:$0xff]   ;;  %v2252_v31 = vld [vmem:[%s7472_s8] sm:$0xf] }
 0x32e   :  { %3743 = vmatprep.subr.bf16.mxu0 %v5268_v8  ;;  %3829 = vmatprep.subr.bf16.mxu1 %v5271_v32  ;;  %v2265_v8 = vrot.slane %v2252_v31, %v6574_v61  ;;  %v2257_v32 = vrot.slane %v2252_v31, %v6473_v1 }
 0x331   :  { %3744 = vmatpush1.bf16.msra.mxu0 %v5266_v33  ;;  %3830 = vmatpush1.bf16.msra.mxu1 %v5269_v34 }
 0x332   :  { %3745 = vmatprep.subr.bf16.mxu0 %v5274_v35  ;;  %3831 = vmatprep.subr.bf16.mxu1 %v5277_v36  ;;  %v2261_v35 = vrot.slane %v2252_v31, %v6481_v3  ;;  %v2269_v36 = vrot.slane %v2252_v31, %v6488_v6  ;;  %v5394_v31 = vld [vmem:[%s7473_s9 + $0x50c] ss:$28 sps:$4 sm:$0xff]  }
 0x335   :  { %3746 = vmatpush1.bf16.msra.mxu0 %v5272_v37  ;;  %3832 = vmatpush1.bf16.msra.mxu1 %v5275_v38 }
 0x336   :  { %3747 = vmatprep.subr.bf16.mxu0 %v5280_v39  ;;  %3833 = vmatprep.subr.bf16.mxu1 %v5283_v40 }
 0x339   :  { %3748 = vmatpush1.bf16.msra.mxu0 %v5278_v41  ;;  %3834 = vmatpush1.bf16.msra.mxu1 %v5281_v42 }
 0x33a   :  { %3749 = vmatprep.subr.bf16.mxu0 %v5286_v43  ;;  %3835 = vmatprep.subr.bf16.mxu1 %v5289_v44 }
 0x33d   :  { %3750 = vmatpush1.bf16.msra.mxu0 %v5284_v45  ;;  %3836 = vmatpush1.bf16.msra.mxu1 %v5287_v46 }
 0x33e   :  { %3751 = vmatprep.subr.bf16.mxu0 %v5292_v47  ;;  %3837 = vmatprep.subr.bf16.mxu1 %v5295_v48 }
 0x341   :  { %3752 = vmatpush1.bf16.msra.mxu0 %v5290_v49  ;;  %3838 = vmatpush1.bf16.msra.mxu1 %v5293_v50 }
 0x342   :  { %3753 = vmatprep.subr.bf16.mxu0 %v5298_v51  ;;  %3839 = vmatprep.subr.bf16.mxu1 %v5301_v52 }
 0x345   :  { %3754 = vmatpush1.bf16.msra.mxu0 %v5296_v53  ;;  %3840 = vmatpush1.bf16.msra.mxu1 %v5299_v54 }
 0x346   :  { %3755 = vmatprep.subr.bf16.mxu0 %v5304_v55  ;;  %3841 = vmatprep.subr.bf16.mxu1 %v5307_v56 }
 0x349   :  { %3756 = vmatpush1.bf16.msra.mxu0 %v5302_v57  ;;  %3842 = vmatpush1.bf16.msra.mxu1 %v5305_v58 }
 0x34a   :  { %3757 = vmatprep.subr.bf16.mxu0 %v5310_v59  ;;  %3843 = vmatprep.subr.bf16.mxu1 %v5313_v60 }
 0x34d   :  { %3758 = vmatpush1.bf16.msra.mxu0 %v5308_v62  ;;  %3844 = vmatpush1.bf16.msra.mxu1 %v5311_v63 }
 0x34e   :  { %3759 = vmatprep.subr.bf16.mxu0 %v5316_v4  ;;  %3845 = vmatprep.subr.bf16.mxu1 %v5319_v5  ;;  %v5350_v4 = vld [vmem:[%s7473_s9 + $0x380] ss:$28 sps:$4 sm:$0xff]   ;;  %v5353_v5 = vld [vmem:[%s7473_s9 + $0x388] ss:$28 sps:$4 sm:$0xff]  }
 0x351   :  { %3760 = vmatpush1.bf16.msra.mxu0 %v5314_v7  ;;  %3846 = vmatpush1.bf16.msra.mxu1 %v5317_v9  ;;  %v5358_v7 = vld [vmem:[%s7473_s9 + $0x3bc] ss:$28 sps:$4 sm:$0xff]   ;;  %v5361_v9 = vld [vmem:[%s7473_s9 + $0x3c4] ss:$28 sps:$4 sm:$0xff]  }
 0x352   :  { %3761 = vmatprep.subr.bf16.mxu0 %v5322_v10  ;;  %3847 = vmatprep.subr.bf16.mxu1 %v5325_v11  ;;  %v5356_v10 = vld [vmem:[%s7473_s9 + $0x3b8] ss:$28 sps:$4 sm:$0xff]   ;;  %v5359_v11 = vld [vmem:[%s7473_s9 + $0x3c0] ss:$28 sps:$4 sm:$0xff]  }
 0x355   :  { %3762 = vmatpush1.bf16.msra.mxu0 %v5320_v12  ;;  %3848 = vmatpush1.bf16.msra.mxu1 %v5323_v13  ;;  %v5364_v12 = vld [vmem:[%s7473_s9 + $0x3f4] ss:$28 sps:$4 sm:$0xff]   ;;  %v5367_v13 = vld [vmem:[%s7473_s9 + $0x3fc] ss:$28 sps:$4 sm:$0xff]  }
 0x356   :  { %3763 = vmatprep.subr.bf16.mxu0 %v5328_v14  ;;  %3849 = vmatprep.subr.bf16.mxu1 %v5331_v16  ;;  %v5362_v14 = vld [vmem:[%s7473_s9 + $0x3f0] ss:$28 sps:$4 sm:$0xff]   ;;  %v5365_v16 = vld [vmem:[%s7473_s9 + $0x3f8] ss:$28 sps:$4 sm:$0xff]  }
 0x359   :  { %3764 = vmatpush1.bf16.msra.mxu0 %v5326_v18  ;;  %3850 = vmatpush1.bf16.msra.mxu1 %v5329_v2  ;;  %v5370_v18 = vld [vmem:[%s7473_s9 + $0x42c] ss:$28 sps:$4 sm:$0xff]   ;;  %v5373_v2 = vld [vmem:[%s7473_s9 + $0x434] ss:$28 sps:$4 sm:$0xff]  }
 0x35a   :  { %3765 = vmatprep.subr.bf16.mxu0 %v5334_v19  ;;  %3851 = vmatprep.subr.bf16.mxu1 %v5337_v20  ;;  %v5368_v19 = vld [vmem:[%s7473_s9 + $0x428] ss:$28 sps:$4 sm:$0xff]   ;;  %v5371_v20 = vld [vmem:[%s7473_s9 + $0x430] ss:$28 sps:$4 sm:$0xff]  }
 0x35d   :  { %3766 = vmatpush1.bf16.msra.mxu0 %v5332_v22  ;;  %3852 = vmatpush1.bf16.msra.mxu1 %v5335_v15  ;;  %v5376_v22 = vld [vmem:[%s7473_s9 + $0x464] ss:$28 sps:$4 sm:$0xff]   ;;  %v5379_v15 = vld [vmem:[%s7473_s9 + $0x46c] ss:$28 sps:$4 sm:$0xff]  }
 0x35e   :  { %3767 = vmatprep.subr.bf16.mxu0 %v5340_v17  ;;  %3853 = vmatprep.subr.bf16.mxu1 %v5343_v21  ;;  %v5374_v17 = vld [vmem:[%s7473_s9 + $0x460] ss:$28 sps:$4 sm:$0xff]   ;;  %v5377_v21 = vld [vmem:[%s7473_s9 + $0x468] ss:$28 sps:$4 sm:$0xff]  }
 0x361   :  { %3768 = vmatpush1.bf16.msra.mxu0 %v5338_v24  ;;  %3854 = vmatpush1.bf16.msra.mxu1 %v5341_v25  ;;  %v5382_v24 = vld [vmem:[%s7473_s9 + $0x49c] ss:$28 sps:$4 sm:$0xff]   ;;  %v5385_v25 = vld [vmem:[%s7473_s9 + $0x4a4] ss:$28 sps:$4 sm:$0xff]  }
 0x362   :  { %3769 = vmatprep.subr.bf16.mxu0 %v5346_v26  ;;  %3855 = vmatprep.subr.bf16.mxu1 %v5349_v27  ;;  %v5380_v26 = vld [vmem:[%s7473_s9 + $0x498] ss:$28 sps:$4 sm:$0xff]   ;;  %v5383_v27 = vld [vmem:[%s7473_s9 + $0x4a0] ss:$28 sps:$4 sm:$0xff]  }
 0x365   :  { %3770 = vmatpush1.bf16.msra.mxu0 %v5344_v28  ;;  %3856 = vmatpush1.bf16.msra.mxu1 %v5347_v23  ;;  %v5388_v28 = vld [vmem:[%s7473_s9 + $0x4d4] ss:$28 sps:$4 sm:$0xff]   ;;  %v5391_v23 = vld [vmem:[%s7473_s9 + $0x4dc] ss:$28 sps:$4 sm:$0xff]  }
 0x366   :  { %3782 = vmatprep.subr.bf16.mxu0 %v5352_v29  ;;  %3868 = vmatprep.subr.bf16.mxu1 %v5355_v30  ;;  %v5386_v29 = vld [vmem:[%s7473_s9 + $0x4d0] ss:$28 sps:$4 sm:$0xff]   ;;  %v5389_v30 = vld [vmem:[%s7473_s9 + $0x4d8] ss:$28 sps:$4 sm:$0xff]  }
 0x3fa   :  { %v2164_v33 = vpop.f32.mrb[4].mxu0  ;;  %v2241_v34 = vpop.f32.mrb[12].mxu1 }
 0x3fb   :  { %v2276_v37 = vadd.f32 %v2265_v8, %v2241_v34  ;;  %v2166_v38 = vpop.f32.mrb[5].mxu0  ;;  %v2243_v39 = vpop.f32.mrb[13].mxu1  ;;  %v2274_v40 = vadd.f32 %v2257_v32, %v2164_v33  ;;  %v5395_v33 = vld [vmem:[%s7473_s9 + $0x510] ss:$28 sps:$4 sm:$0xff]   ;;  %v5400_v34 = vld [vmem:[%s7473_s9 + $0x544] ss:$28 sps:$4 sm:$0xff]  }
 0x3fc   :  { %v2275_v41 = vadd.f32 %v2261_v35, %v2166_v38  ;;  %v2277_v42 = vadd.f32 %v2269_v36, %v2243_v39  ;;  %v5406_v38 = vld [vmem:[%s7473_s9 + $0x57c] ss:$28 sps:$4 sm:$0xff]   ;;  %v5409_v39 = vld [vmem:[%s7473_s9 + $0x584] ss:$28 sps:$4 sm:$0xff]  }
 0x3fd   :  { %v2282_v51 = vmax.f32 %v2274_v40, 0.0  ;;  %v2284_v52 = vmax.f32 %v2276_v37, 0.0  ;;  %v5401_v37 = vld [vmem:[%s7473_s9 + $0x548] ss:$28 sps:$4 sm:$0xff]   ;;  %v5404_v40 = vld [vmem:[%s7473_s9 + $0x578] ss:$28 sps:$4 sm:$0xff]  }
 0x3fe   :  { %v2170_v43 = vpop.f32.mrb[6].mxu0  ;;  %v2247_v44 = vpop.f32.mrb[14].mxu1  ;;  %v2283_v55 = vmax.f32 %v2275_v41, 0.0  ;;  %v2285_v56 = vmax.f32 %v2277_v42, 0.0  ;;  %v5407_v41 = vld [vmem:[%s7473_s9 + $0x580] ss:$28 sps:$4 sm:$0xff]  }
 0x3ff   :  { %v2278_v45 = vadd.f32 %v2257_v32, %v2170_v43  ;;  %v2280_v46 = vadd.f32 %v2265_v8, %v2247_v44  ;;  %v2172_v47 = vpop.f32.mrb[7].mxu0  ;;  %v2249_v48 = vpop.f32.mrb[15].mxu1  ;;  %v5397_v8 = vld [vmem:[%s7473_s9 + $0x514] ss:$28 sps:$4 sm:$0xff]   ;;  %v5392_v32 = vld [vmem:[%s7473_s9 + $0x508] ss:$28 sps:$4 sm:$0xff]  }
 0x400   :  { %v2279_v49 = vadd.f32 %v2261_v35, %v2172_v47  ;;  %v2281_v50 = vadd.f32 %v2269_v36, %v2249_v48  ;;  %v5403_v35 = vld [vmem:[%s7473_s9 + $0x54c] ss:$28 sps:$4 sm:$0xff]   ;;  %v5398_v36 = vld [vmem:[%s7473_s9 + $0x540] ss:$28 sps:$4 sm:$0xff]   ;;  %v5412_v42 = vld [vmem:[%s7473_s9 + $0x5b4] ss:$28 sps:$4 sm:$0xff]  }
 0x401   :  { %v2286_v53 = vmax.f32 %v2278_v45, 0.0  ;;  %v2288_v54 = vmax.f32 %v2280_v46, 0.0  ;;  %v5415_v43 = vld [vmem:[%s7473_s9 + $0x5bc] ss:$28 sps:$4 sm:$0xff]   ;;  %v5410_v44 = vld [vmem:[%s7473_s9 + $0x5b0] ss:$28 sps:$4 sm:$0xff]  }
 0x402   :  { %v2287_v57 = vmax.f32 %v2279_v49, 0.0  ;;  %v2289_v58 = vmax.f32 %v2281_v50, 0.0  ;;  %v5413_v45 = vld [vmem:[%s7473_s9 + $0x5b8] ss:$28 sps:$4 sm:$0xff]   ;;  %v5418_v46 = vld [vmem:[%s7473_s9 + $0x5ec] ss:$28 sps:$4 sm:$0xff]  }
 0x403   :  { %v6921_v59 = vpack.c.bf16 %v2286_v53, %v2282_v51  ;;  %v6923_v60 = vpack.c.bf16 %v2288_v54, %v2284_v52  ;;  %v5421_v47 = vld [vmem:[%s7473_s9 + $0x5f4] ss:$28 sps:$4 sm:$0xff]   ;;  %v5416_v48 = vld [vmem:[%s7473_s9 + $0x5e8] ss:$28 sps:$4 sm:$0xff]   ;;  %v5422_v52 = vld [vmem:[%s7473_s9 + $0x620] ss:$28 sps:$4 sm:$0xff]  }
 0x404   :  { %v6925_v62 = vpack.c.bf16 %v2287_v57, %v2283_v55  ;;  %v6927_v63 = vpack.c.bf16 %v2289_v58, %v2285_v56  ;;  %v5419_v49 = vld [vmem:[%s7473_s9 + $0x5f0] ss:$28 sps:$4 sm:$0xff]   ;;  %v5424_v50 = vld [vmem:[%s7473_s9 + $0x624] ss:$28 sps:$4 sm:$0xff]   ;;  %v5430_v54 = vld [vmem:[%s7473_s9 + $0x65c] ss:$28 sps:$4 sm:$0xff]  }
 0x405   :  { %v5427_v51 = vld [vmem:[%s7473_s9 + $0x62c] ss:$28 sps:$4 sm:$0xff]   ;;  %v5433_v55 = vld [vmem:[%s7473_s9 + $0x664] ss:$28 sps:$4 sm:$0xff]   ;;  %v5428_v56 = vld [vmem:[%s7473_s9 + $0x658] ss:$28 sps:$4 sm:$0xff]  }
 0x406   :  { %3771 = vmatprep.mubr.bf16.mxu0 %v6925_v62  ;;  %3857 = vmatprep.mubr.bf16.mxu1 %v6925_v62  ;;  %v5425_v53 = vld [vmem:[%s7473_s9 + $0x628] ss:$28 sps:$4 sm:$0xff]   ;;  %v5431_v57 = vld [vmem:[%s7473_s9 + $0x660] ss:$28 sps:$4 sm:$0xff]   ;;  %v5436_v58 = vld [vmem:[%s7473_s9 + $0x694] ss:$28 sps:$4 sm:$0xff]  }
 0x407   :  { %3772 = vmatmul.mubr.bf16.vlgmr.msra.gmra.mrb[8].mxu0 %v6921_v59  ;;  %3858 = vmatmul.mubr.bf16.vlgmr.msra.gmra.mrb[16].mxu1 %v6921_v59 }
 0x408   :  { %3783 = vmatpush1.bf16.msra.mxu0 %v5350_v4  ;;  %3869 = vmatpush1.bf16.msra.mxu1 %v5353_v5  ;;  %v5439_v4 = vld [vmem:[%s7473_s9 + $0x69c] ss:$28 sps:$4 sm:$0xff]   ;;  %v5434_v5 = vld [vmem:[%s7473_s9 + $0x690] ss:$28 sps:$4 sm:$0xff]  }
 0x409   :  { %3814 = vmatprep.mubr.bf16.mxu0 %v6927_v63  ;;  %3900 = vmatprep.mubr.bf16.mxu1 %v6927_v63 }
 0x40a   :  { %3784 = vmatprep.subr.bf16.mxu0 %v5358_v7  ;;  %3870 = vmatprep.subr.bf16.mxu1 %v5361_v9  ;;  %v5437_v7 = vld [vmem:[%s7473_s9 + $0x698] ss:$28 sps:$4 sm:$0xff]   ;;  %v5442_v9 = vld [vmem:[%s7473_s9 + $0x6cc] ss:$28 sps:$4 sm:$0xff]  }
 0x40c   :  { %3785 = vmatpush1.bf16.msra.mxu0 %v5356_v10  ;;  %3871 = vmatpush1.bf16.msra.mxu1 %v5359_v11  ;;  %v5445_v10 = vld [vmem:[%s7473_s9 + $0x6d4] ss:$28 sps:$4 sm:$0xff]   ;;  %v5440_v11 = vld [vmem:[%s7473_s9 + $0x6c8] ss:$28 sps:$4 sm:$0xff]  }
 0x40d   :  { %3786 = vmatprep.subr.bf16.mxu0 %v5364_v12  ;;  %3872 = vmatprep.subr.bf16.mxu1 %v5367_v13  ;;  %v5443_v12 = vld [vmem:[%s7473_s9 + $0x6d0] ss:$28 sps:$4 sm:$0xff]  }
 0x40e   :  { %v5448_v13 = vld [vmem:[%s7473_s9 + $0x14] ss:$28 sps:$4 sm:$0xff]  }
 0x410   :  { %3787 = vmatpush1.bf16.msra.mxu0 %v5362_v14  ;;  %3873 = vmatpush1.bf16.msra.mxu1 %v5365_v16  ;;  %v5449_v14 = vld [vmem:[%s7473_s9 + $0x1d8] ss:$28 sps:$4 sm:$0xff]   ;;  %v5446_v16 = vld [vmem:[%s7473_s9 + $0x10] ss:$28 sps:$4 sm:$0xff]  }
 0x411   :  { %3788 = vmatprep.subr.bf16.mxu0 %v5370_v18  ;;  %3874 = vmatprep.subr.bf16.mxu1 %v5373_v2  ;;  %v5450_v18 = vld [vmem:[%s7473_s9 + $0x18] ss:$28 sps:$4 sm:$0xff]   ;;  %v5453_v2 = vld [vmem:[%s7473_s9 + $0x4c] ss:$28 sps:$4 sm:$0xff]  }
 0x414   :  { %3789 = vmatpush1.bf16.msra.mxu0 %v5368_v19  ;;  %3875 = vmatpush1.bf16.msra.mxu1 %v5371_v20  ;;  %v5454_v19 = vld [vmem:[%s7473_s9 + $0x210] ss:$28 sps:$4 sm:$0xff]   ;;  %v5451_v20 = vld [vmem:[%s7473_s9 + $0x48] ss:$28 sps:$4 sm:$0xff]  }
 0x415   :  { %3790 = vmatprep.subr.bf16.mxu0 %v5376_v22  ;;  %3876 = vmatprep.subr.bf16.mxu1 %v5379_v15  ;;  %v5455_v22 = vld [vmem:[%s7473_s9 + $0x50] ss:$28 sps:$4 sm:$0xff]   ;;  %v5458_v15 = vld [vmem:[%s7473_s9 + $0x84] ss:$28 sps:$4 sm:$0xff]  }
 0x418   :  { %3791 = vmatpush1.bf16.msra.mxu0 %v5374_v17  ;;  %3877 = vmatpush1.bf16.msra.mxu1 %v5377_v21  ;;  %v5459_v17 = vld [vmem:[%s7473_s9 + $0x248] ss:$28 sps:$4 sm:$0xff]   ;;  %v5456_v21 = vld [vmem:[%s7473_s9 + $0x80] ss:$28 sps:$4 sm:$0xff]  }
 0x419   :  { %3792 = vmatprep.subr.bf16.mxu0 %v5382_v24  ;;  %3878 = vmatprep.subr.bf16.mxu1 %v5385_v25  ;;  %v5463_v24 = vld [vmem:[%s7473_s9 + $0xbc] ss:$28 sps:$4 sm:$0xff]  }
 0x41a   :  { %v5464_v25 = vld [vmem:[%s7473_s9 + $0x280] ss:$28 sps:$4 sm:$0xff]  }
 0x41c   :  { %3793 = vmatpush1.bf16.msra.mxu0 %v5380_v26  ;;  %3879 = vmatpush1.bf16.msra.mxu1 %v5383_v27  ;;  %v5461_v26 = vld [vmem:[%s7473_s9 + $0xb8] ss:$28 sps:$4 sm:$0xff]   ;;  %v5465_v27 = vld [vmem:[%s7473_s9 + $0xc0] ss:$28 sps:$4 sm:$0xff]  }
 0x41d   :  { %3794 = vmatprep.subr.bf16.mxu0 %v5388_v28  ;;  %3880 = vmatprep.subr.bf16.mxu1 %v5391_v23  ;;  %v5468_v28 = vld [vmem:[%s7473_s9 + $0xf4] ss:$28 sps:$4 sm:$0xff]  }
 0x41e   :  { %v5469_v23 = vld [vmem:[%s7473_s9 + $0x2b8] ss:$28 sps:$4 sm:$0xff]  }
 0x420   :  { %3795 = vmatpush1.bf16.msra.mxu0 %v5386_v29  ;;  %3881 = vmatpush1.bf16.msra.mxu1 %v5389_v30  ;;  %v5466_v29 = vld [vmem:[%s7473_s9 + $0xf0] ss:$28 sps:$4 sm:$0xff]   ;;  %v5470_v30 = vld [vmem:[%s7473_s9 + $0xf8] ss:$28 sps:$4 sm:$0xff]  }
 0x421   :  { %3796 = vmatprep.subr.bf16.mxu0 %v5394_v31  ;;  %3882 = vmatprep.subr.bf16.mxu1 %v5397_v8  ;;  %v5473_v31 = vld [vmem:[%s7473_s9 + $0x12c] ss:$28 sps:$4 sm:$0xff]  }
 0x422   :  { %v5474_v8 = vld [vmem:[%s7473_s9 + $0x2f0] ss:$28 sps:$4 sm:$0xff]  }
 0x424   :  { %3797 = vmatpush1.bf16.msra.mxu0 %v5392_v32  ;;  %3883 = vmatpush1.bf16.msra.mxu1 %v5395_v33  ;;  %v5471_v32 = vld [vmem:[%s7473_s9 + $0x128] ss:$28 sps:$4 sm:$0xff]   ;;  %v5475_v33 = vld [vmem:[%s7473_s9 + $0x130] ss:$28 sps:$4 sm:$0xff]  }
 0x425   :  { %3798 = vmatprep.subr.bf16.mxu0 %v5400_v34  ;;  %3884 = vmatprep.subr.bf16.mxu1 %v5403_v35  ;;  %v5478_v34 = vld [vmem:[%s7473_s9 + $0x164] ss:$28 sps:$4 sm:$0xff]  }
 0x426   :  { %v5479_v35 = vld [vmem:[%s7473_s9 + $0x328] ss:$28 sps:$4 sm:$0xff]  }
 0x428   :  { %3799 = vmatpush1.bf16.msra.mxu0 %v5398_v36  ;;  %3885 = vmatpush1.bf16.msra.mxu1 %v5401_v37  ;;  %v5476_v36 = vld [vmem:[%s7473_s9 + $0x160] ss:$28 sps:$4 sm:$0xff]   ;;  %v5480_v37 = vld [vmem:[%s7473_s9 + $0x168] ss:$28 sps:$4 sm:$0xff]  }
 0x429   :  { %3800 = vmatprep.subr.bf16.mxu0 %v5406_v38  ;;  %3886 = vmatprep.subr.bf16.mxu1 %v5409_v39  ;;  %v5483_v38 = vld [vmem:[%s7473_s9 + $0x19c] ss:$28 sps:$4 sm:$0xff]  }
 0x42a   :  { %v5484_v39 = vld [vmem:[%s7473_s9 + $0x360] ss:$28 sps:$4 sm:$0xff]  }
 0x42c   :  { %3801 = vmatpush1.bf16.msra.mxu0 %v5404_v40  ;;  %3887 = vmatpush1.bf16.msra.mxu1 %v5407_v41  ;;  %v5481_v40 = vld [vmem:[%s7473_s9 + $0x198] ss:$28 sps:$4 sm:$0xff]   ;;  %v5485_v41 = vld [vmem:[%s7473_s9 + $0x1a0] ss:$28 sps:$4 sm:$0xff]  }
 0x42d   :  { %3802 = vmatprep.subr.bf16.mxu0 %v5412_v42  ;;  %3888 = vmatprep.subr.bf16.mxu1 %v5415_v43  ;;  %v5488_v42 = vld [vmem:[%s7473_s9 + $0x1d4] ss:$28 sps:$4 sm:$0xff]  }
 0x42e   :  { %v5489_v43 = vld [vmem:[%s7473_s9 + $0x558] ss:$28 sps:$4 sm:$0xff]  }
 0x430   :  { %3803 = vmatpush1.bf16.msra.mxu0 %v5410_v44  ;;  %3889 = vmatpush1.bf16.msra.mxu1 %v5413_v45  ;;  %v5486_v44 = vld [vmem:[%s7473_s9 + $0x1d0] ss:$28 sps:$4 sm:$0xff]   ;;  %v5490_v45 = vld [vmem:[%s7473_s9 + $0x398] ss:$28 sps:$4 sm:$0xff]  }
 0x431   :  { %3804 = vmatprep.subr.bf16.mxu0 %v5418_v46  ;;  %3890 = vmatprep.subr.bf16.mxu1 %v5421_v47  ;;  %v5493_v46 = vld [vmem:[%s7473_s9 + $0x20c] ss:$28 sps:$4 sm:$0xff]  }
 0x432   :  { %v5494_v47 = vld [vmem:[%s7473_s9 + $0x590] ss:$28 sps:$4 sm:$0xff]  }
 0x434   :  { %3805 = vmatpush1.bf16.msra.mxu0 %v5416_v48  ;;  %3891 = vmatpush1.bf16.msra.mxu1 %v5419_v49  ;;  %v5491_v48 = vld [vmem:[%s7473_s9 + $0x208] ss:$28 sps:$4 sm:$0xff]   ;;  %v5495_v49 = vld [vmem:[%s7473_s9 + $0x3d0] ss:$28 sps:$4 sm:$0xff]  }
 0x435   :  { %3806 = vmatprep.subr.bf16.mxu0 %v5424_v50  ;;  %3892 = vmatprep.subr.bf16.mxu1 %v5427_v51  ;;  %v5498_v50 = vld [vmem:[%s7473_s9 + $0x244] ss:$28 sps:$4 sm:$0xff]  }
 0x436   :  { %v5499_v51 = vld [vmem:[%s7473_s9 + $0x5c8] ss:$28 sps:$4 sm:$0xff]  }
 0x438   :  { %3807 = vmatpush1.bf16.msra.mxu0 %v5422_v52  ;;  %3893 = vmatpush1.bf16.msra.mxu1 %v5425_v53  ;;  %v5496_v52 = vld [vmem:[%s7473_s9 + $0x240] ss:$28 sps:$4 sm:$0xff]   ;;  %v5500_v53 = vld [vmem:[%s7473_s9 + $0x408] ss:$28 sps:$4 sm:$0xff]  }
 0x439   :  { %3808 = vmatprep.subr.bf16.mxu0 %v5430_v54  ;;  %3894 = vmatprep.subr.bf16.mxu1 %v5433_v55  ;;  %v5503_v54 = vld [vmem:[%s7473_s9 + $0x27c] ss:$28 sps:$4 sm:$0xff]  }
 0x43a   :  { %v5504_v55 = vld [vmem:[%s7473_s9 + $0x600] ss:$28 sps:$4 sm:$0xff]  }
 0x43c   :  { %3809 = vmatpush1.bf16.msra.mxu0 %v5428_v56  ;;  %3895 = vmatpush1.bf16.msra.mxu1 %v5431_v57  ;;  %v5501_v56 = vld [vmem:[%s7473_s9 + $0x278] ss:$28 sps:$4 sm:$0xff]   ;;  %v5505_v57 = vld [vmem:[%s7473_s9 + $0x440] ss:$28 sps:$4 sm:$0xff]  }
 0x43d   :  { %3810 = vmatprep.subr.bf16.mxu0 %v5436_v58  ;;  %3896 = vmatprep.subr.bf16.mxu1 %v5439_v4  ;;  %v5508_v58 = vld [vmem:[%s7473_s9 + $0x2b4] ss:$28 sps:$4 sm:$0xff]  }
 0x43e   :  { %v5509_v4 = vld [vmem:[%s7473_s9 + $0x638] ss:$28 sps:$4 sm:$0xff]  }
 0x440   :  { %3811 = vmatpush1.bf16.msra.mxu0 %v5434_v5  ;;  %3897 = vmatpush1.bf16.msra.mxu1 %v5437_v7  ;;  %v5506_v5 = vld [vmem:[%s7473_s9 + $0x2b0] ss:$28 sps:$4 sm:$0xff]   ;;  %v5510_v7 = vld [vmem:[%s7473_s9 + $0x478] ss:$28 sps:$4 sm:$0xff]  }
 0x441   :  { %3812 = vmatprep.subr.bf16.mxu0 %v5442_v9  ;;  %3898 = vmatprep.subr.bf16.mxu1 %v5445_v10  ;;  %v5513_v9 = vld [vmem:[%s7473_s9 + $0x2ec] ss:$28 sps:$4 sm:$0xff]  }
 0x442   :  { %v5514_v10 = vld [vmem:[%s7473_s9 + $0x670] ss:$28 sps:$4 sm:$0xff]  }
 0x444   :  { %3813 = vmatpush1.bf16.msra.mxu0 %v5440_v11  ;;  %3899 = vmatpush1.bf16.msra.mxu1 %v5443_v12  ;;  %v5511_v11 = vld [vmem:[%s7473_s9 + $0x2e8] ss:$28 sps:$4 sm:$0xff]   ;;  %v5515_v12 = vld [vmem:[%s7473_s9 + $0x4b0] ss:$28 sps:$4 sm:$0xff]  }
 0x445   :  { %3911 = vmatprep.subr.bf16.mxu0 %v5448_v13  ;;  %4748 = vmatprep.subr.bf16.mxu1 %v5449_v14  ;;  %v5518_v13 = vld [vmem:[%s7473_s9 + $0x324] ss:$28 sps:$4 sm:$0xff]  }
 0x446   :  { %v5519_v14 = vld [vmem:[%s7473_s9 + $0x6a8] ss:$28 sps:$4 sm:$0xff]  }
 0x447   :  { %3815 = vmatmul.mubr.bf16.vlgmr.msra.gmra.mrb[8].mxu0 %v6923_v60  ;;  %3901 = vmatmul.mubr.bf16.vlgmr.msra.gmra.mrb[16].mxu1 %v6923_v60 }
 0x448   :  { %3912 = vmatpush1.bf16.msra.mxu0 %v5446_v16  ;;  %3943 = vmatprep.mubr.bf16.mxu0 %v6925_v62  ;;  %v5516_v16 = vld [vmem:[%s7473_s9 + $0x320] ss:$28 sps:$4 sm:$0xff]  }
 0x449   :  { %4749 = vmatpush3.bf16.msra.mxu1 %v5450_v18  ;;  %4029 = vmatprep.mubr.bf16.mxu1 %v6925_v62  ;;  %v5460_v62 = vld [vmem:[%s7473_s9 + $0x88] ss:$28 sps:$4 sm:$0xff]  }
 0x44a   :  { %3913 = vmatprep.subr.bf16.mxu0 %v5453_v2  ;;  %4750 = vmatprep.subr.bf16.mxu1 %v5454_v19  ;;  %v5520_v18 = vld [vmem:[%s7473_s9 + $0x4e8] ss:$28 sps:$4 sm:$0xff]   ;;  %v5523_v2 = vld [vmem:[%s7473_s9 + $0x35c] ss:$28 sps:$4 sm:$0xff]  }
 0x44b   :  { %v5524_v19 = vld [vmem:[%s7473_s9 + $0x6e0] ss:$28 sps:$4 sm:$0xff]  }
 0x44c   :  { %3914 = vmatpush1.bf16.msra.mxu0 %v5451_v20  ;;  %v5521_v20 = vld [vmem:[%s7473_s9 + $0x358] ss:$28 sps:$4 sm:$0xff]  }
 0x44d   :  { %4751 = vmatpush3.bf16.msra.mxu1 %v5455_v22  ;;  %3915 = vmatprep.subr.bf16.mxu0 %v5458_v15  ;;  %v5525_v22 = vld [vmem:[%s7473_s9 + $0x520] ss:$28 sps:$4 sm:$0xff]   ;;  %v5528_v15 = vld [vmem:[%s7473_s9 + $0x394] ss:$28 sps:$4 sm:$0xff]  }
 0x44e   :  { %4752 = vmatprep.subr.bf16.mxu1 %v5459_v17  ;;  %v5526_v17 = vld [vmem:[%s7473_s9 + $0x390] ss:$28 sps:$4 sm:$0xff]  }
 0x450   :  { %3916 = vmatpush1.bf16.msra.mxu0 %v5456_v21  ;;  %v5531_v21 = vld [vmem:[%s7473_s9 + $0x3cc] ss:$28 sps:$4 sm:$0xff]  }
 0x451   :  { %4753 = vmatpush3.bf16.msra.mxu1 %v5460_v62  ;;  %3917 = vmatprep.subr.bf16.mxu0 %v5463_v24  ;;  %v5529_v62 = vld [vmem:[%s7473_s9 + $0x3c8] ss:$28 sps:$4 sm:$0xff]  }
 0x452   :  { %4754 = vmatprep.subr.bf16.mxu1 %v5464_v25  ;;  %v5534_v24 = vld [vmem:[%s7473_s9 + $0x404] ss:$28 sps:$4 sm:$0xff]  }
 0x453   :  { %v5532_v25 = vld [vmem:[%s7473_s9 + $0x400] ss:$28 sps:$4 sm:$0xff]  }
 0x454   :  { %3918 = vmatpush1.bf16.msra.mxu0 %v5461_v26  ;;  %v5540_v26 = vld [vmem:[%s7473_s9 + $0x474] ss:$28 sps:$4 sm:$0xff]  }
 0x455   :  { %4755 = vmatpush3.bf16.msra.mxu1 %v5465_v27  ;;  %3919 = vmatprep.subr.bf16.mxu0 %v5468_v28  ;;  %v5538_v27 = vld [vmem:[%s7473_s9 + $0x470] ss:$28 sps:$4 sm:$0xff]  }
 0x456   :  { %4756 = vmatprep.subr.bf16.mxu1 %v5469_v23  ;;  %v5543_v28 = vld [vmem:[%s7473_s9 + $0x4ac] ss:$28 sps:$4 sm:$0xff]  }
 0x457   :  { %v5541_v23 = vld [vmem:[%s7473_s9 + $0x4a8] ss:$28 sps:$4 sm:$0xff]  }
 0x458   :  { %3920 = vmatpush1.bf16.msra.mxu0 %v5466_v29  ;;  %v5546_v29 = vld [vmem:[%s7473_s9 + $0x4e4] ss:$28 sps:$4 sm:$0xff]  }
 0x459   :  { %4757 = vmatpush3.bf16.msra.mxu1 %v5470_v30  ;;  %3921 = vmatprep.subr.bf16.mxu0 %v5473_v31  ;;  %v5544_v30 = vld [vmem:[%s7473_s9 + $0x4e0] ss:$28 sps:$4 sm:$0xff]  }
 0x45a   :  { %4758 = vmatprep.subr.bf16.mxu1 %v5474_v8  ;;  %v5549_v31 = vld [vmem:[%s7473_s9 + $0x51c] ss:$28 sps:$4 sm:$0xff]  }
 0x45b   :  { %v5547_v8 = vld [vmem:[%s7473_s9 + $0x518] ss:$28 sps:$4 sm:$0xff]  }
 0x45c   :  { %3922 = vmatpush1.bf16.msra.mxu0 %v5471_v32  ;;  %v5552_v32 = vld [vmem:[%s7473_s9 + $0x554] ss:$28 sps:$4 sm:$0xff]  }
 0x45d   :  { %4759 = vmatpush3.bf16.msra.mxu1 %v5475_v33  ;;  %3923 = vmatprep.subr.bf16.mxu0 %v5478_v34  ;;  %v5550_v33 = vld [vmem:[%s7473_s9 + $0x550] ss:$28 sps:$4 sm:$0xff]  }
 0x45e   :  { %4760 = vmatprep.subr.bf16.mxu1 %v5479_v35  ;;  %v5555_v34 = vld [vmem:[%s7473_s9 + $0x58c] ss:$28 sps:$4 sm:$0xff]  }
 0x45f   :  { %v5553_v35 = vld [vmem:[%s7473_s9 + $0x588] ss:$28 sps:$4 sm:$0xff]  }
 0x460   :  { %3924 = vmatpush1.bf16.msra.mxu0 %v5476_v36  ;;  %v5558_v36 = vld [vmem:[%s7473_s9 + $0x5c4] ss:$28 sps:$4 sm:$0xff]  }
 0x461   :  { %4761 = vmatpush3.bf16.msra.mxu1 %v5480_v37  ;;  %3925 = vmatprep.subr.bf16.mxu0 %v5483_v38  ;;  %v5556_v37 = vld [vmem:[%s7473_s9 + $0x5c0] ss:$28 sps:$4 sm:$0xff]  }
 0x462   :  { %4762 = vmatprep.subr.bf16.mxu1 %v5484_v39  ;;  %v5561_v38 = vld [vmem:[%s7473_s9 + $0x5fc] ss:$28 sps:$4 sm:$0xff]  }
 0x463   :  { %v5559_v39 = vld [vmem:[%s7473_s9 + $0x5f8] ss:$28 sps:$4 sm:$0xff]  }
 0x464   :  { %3926 = vmatpush1.bf16.msra.mxu0 %v5481_v40  ;;  %v5564_v40 = vld [vmem:[%s7473_s9 + $0x634] ss:$28 sps:$4 sm:$0xff]  }
 0x465   :  { %4763 = vmatpush3.bf16.msra.mxu1 %v5485_v41  ;;  %3927 = vmatprep.subr.bf16.mxu0 %v5488_v42  ;;  %v5562_v41 = vld [vmem:[%s7473_s9 + $0x630] ss:$28 sps:$4 sm:$0xff]  }
 0x466   :  { %4770 = vmatprep.subr.bf16.mxu1 %v5489_v43  ;;  %v5567_v42 = vld [vmem:[%s7473_s9 + $0x66c] ss:$28 sps:$4 sm:$0xff]  }
 0x467   :  { %v5565_v43 = vld [vmem:[%s7473_s9 + $0x668] ss:$28 sps:$4 sm:$0xff]  }
 0x468   :  { %4030 = vmatmul.mubr.bf16.vlgmr.msra.gmra.mrb[20].mxu1 %v6921_v59  ;;  %3928 = vmatpush1.bf16.msra.mxu0 %v5486_v44  ;;  %v5570_v44 = vld [vmem:[%s7473_s9 + $0x6a4] ss:$28 sps:$4 sm:$0xff]  }
 0x469   :  { %4771 = vmatpush3.bf16.msra.mxu1 %v5490_v45  ;;  %4070 = vmatprep.mubr.bf16.mxu1 %v6927_v63  ;;  %v5568_v45 = vld [vmem:[%s7473_s9 + $0x6a0] ss:$28 sps:$4 sm:$0xff]  }
 0x46a   :  { %3929 = vmatprep.subr.bf16.mxu0 %v5493_v46  ;;  %4772 = vmatprep.subr.bf16.mxu1 %v5494_v47  ;;  %v5573_v46 = vld [vmem:[%s7473_s9 + $0x6dc] ss:$28 sps:$4 sm:$0xff]  }
 0x46b   :  { %v5571_v47 = vld [vmem:[%s7473_s9 + $0x6d8] ss:$28 sps:$4 sm:$0xff]  }
 0x46c   :  { %3930 = vmatpush1.bf16.msra.mxu0 %v5491_v48  ;;  %v7422_v48 = vld [vmem:[%s7474_s10] sm:$0x7f] }
 0x46d   :  { %4773 = vmatpush3.bf16.msra.mxu1 %v5495_v49  ;;  %3931 = vmatprep.subr.bf16.mxu0 %v5498_v50  ;;  %v2555_v49 = vrot.slane %v7422_v48, %v6473_v1  ;;  %v2563_v50 = vrot.slane %v7422_v48, %v6574_v61 }
 0x46e   :  { %4774 = vmatprep.subr.bf16.mxu1 %v5499_v51  ;;  %v2559_v51 = vrot.slane %v7422_v48, %v6481_v3 }
 0x470   :  { %3932 = vmatpush1.bf16.msra.mxu0 %v5496_v52  ;;  %v2567_v52 = vrot.slane %v7422_v48, %v6488_v6 }
 0x471   :  { %4775 = vmatpush3.bf16.msra.mxu1 %v5500_v53  ;;  %3933 = vmatprep.subr.bf16.mxu0 %v5503_v54 }
 0x472   :  { %4776 = vmatprep.subr.bf16.mxu1 %v5504_v55 }
 0x474   :  { %3934 = vmatpush1.bf16.msra.mxu0 %v5501_v56 }
 0x475   :  { %4777 = vmatpush3.bf16.msra.mxu1 %v5505_v57  ;;  %3935 = vmatprep.subr.bf16.mxu0 %v5508_v58 }
 0x476   :  { %4778 = vmatprep.subr.bf16.mxu1 %v5509_v4 }
 0x478   :  { %3936 = vmatpush1.bf16.msra.mxu0 %v5506_v5 }
 0x479   :  { %4779 = vmatpush3.bf16.msra.mxu1 %v5510_v7  ;;  %3937 = vmatprep.subr.bf16.mxu0 %v5513_v9 }
 0x47a   :  { %4780 = vmatprep.subr.bf16.mxu1 %v5514_v10 }
 0x47c   :  { %3938 = vmatpush1.bf16.msra.mxu0 %v5511_v11 }
 0x47d   :  { %4781 = vmatpush3.bf16.msra.mxu1 %v5515_v12  ;;  %3939 = vmatprep.subr.bf16.mxu0 %v5518_v13 }
 0x47e   :  { %4782 = vmatprep.subr.bf16.mxu1 %v5519_v14 }
 0x480   :  { %3940 = vmatpush1.bf16.msra.mxu0 %v5516_v16 }
 0x481   :  { %4783 = vmatpush3.bf16.msra.mxu1 %v5520_v18  ;;  %3941 = vmatprep.subr.bf16.mxu0 %v5523_v2 }
 0x482   :  { %4784 = vmatprep.subr.bf16.mxu1 %v5524_v19 }
 0x484   :  { %3942 = vmatpush1.bf16.msra.mxu0 %v5521_v20 }
 0x485   :  { %4785 = vmatpush3.bf16.msra.mxu1 %v5525_v22  ;;  %3954 = vmatprep.subr.bf16.mxu0 %v5528_v15 }
 0x487   :  { %3944 = vmatmul.mubr.bf16.vlgmr.msra.gmra.mrb[12].mxu0 %v6921_v59  ;;  %v5537_v59 = vld [vmem:[%s7473_s9 + $0x43c] ss:$28 sps:$4 sm:$0xff]  }
 0x488   :  { %4071 = vmatmul.mubr.bf16.vlgmr.msra.gmra.mrb[24].mxu1 %v6923_v60  ;;  %3955 = vmatpush1.bf16.msra.mxu0 %v5526_v17 }
 0x489   :  { %3986 = vmatprep.mubr.bf16.mxu0 %v6927_v63  ;;  %3956 = vmatprep.subr.bf16.mxu0 %v5531_v21  ;;  %v5535_v63 = vld [vmem:[%s7473_s9 + $0x438] ss:$28 sps:$4 sm:$0xff]   ;;  %s5686_s9 = smov [#allocation4]  }
 0x48a   :  { %s4197_s10 = sshll.u32 %s5686_s9, 4  ;;  %s4198_s10 = int_to_ptr.vmem [resolvable:$true] %s4197_s10 }
 0x48b   :  { %s5634_s18 = scalar_lea.vmem %s4198_s10, 256  ;;  %p5639_p1 = scmp.lt.s32.totalorder %s4198_s10, %s4198_s10 }
 0x48c   :  { %3957 = vmatpush1.bf16.msra.mxu0 %v5529_v62  ;;  %p5635_p0 = scmp.ne.s32.totalorder %s4198_s10, %s5634_s18  ;;  %p5640_p2 = scmp.lt.s32.totalorder %s5634_s18, %s5634_s18 }
 0x48d   :  { %3958 = vmatprep.subr.bf16.mxu0 %v5534_v24 }
 0x48e   :  { %p5641_p3 = por %p5640_p2, %p5639_p1 }
 0x490   :  { %3959 = vmatpush1.bf16.msra.mxu0 %v5532_v25  ;;  %p5642_p4 = pnand %p5641_p3, %p5635_p0 }
 0x491   :  { %3960 = vmatprep.subr.bf16.mxu0 %v5537_v59 }
 0x494   :  { %3961 = vmatpush1.bf16.msra.mxu0 %v5535_v63 }
 0x495   :  { %3962 = vmatprep.subr.bf16.mxu0 %v5540_v26 }
 0x498   :  { %3963 = vmatpush1.bf16.msra.mxu0 %v5538_v27 }
 0x499   :  { %3964 = vmatprep.subr.bf16.mxu0 %v5543_v28 }
 0x49c   :  { %3965 = vmatpush1.bf16.msra.mxu0 %v5541_v23 }
 0x49d   :  { %3966 = vmatprep.subr.bf16.mxu0 %v5546_v29 }
 0x4a0   :  { %3967 = vmatpush1.bf16.msra.mxu0 %v5544_v30 }
 0x4a1   :  { %3968 = vmatprep.subr.bf16.mxu0 %v5549_v31 }
 0x4a4   :  { %3969 = vmatpush1.bf16.msra.mxu0 %v5547_v8 }
 0x4a5   :  { %3970 = vmatprep.subr.bf16.mxu0 %v5552_v32 }
 0x4a8   :  { %3971 = vmatpush1.bf16.msra.mxu0 %v5550_v33 }
 0x4a9   :  { %3972 = vmatprep.subr.bf16.mxu0 %v5555_v34 }
 0x4ac   :  { %3973 = vmatpush1.bf16.msra.mxu0 %v5553_v35 }
 0x4ad   :  { %3974 = vmatprep.subr.bf16.mxu0 %v5558_v36 }
 0x4b0   :  { %3975 = vmatpush1.bf16.msra.mxu0 %v5556_v37 }
 0x4b1   :  { %3976 = vmatprep.subr.bf16.mxu0 %v5561_v38 }
 0x4b4   :  { %3977 = vmatpush1.bf16.msra.mxu0 %v5559_v39 }
 0x4b5   :  { %3978 = vmatprep.subr.bf16.mxu0 %v5564_v40 }
 0x4b8   :  { %3979 = vmatpush1.bf16.msra.mxu0 %v5562_v41 }
 0x4b9   :  { %3980 = vmatprep.subr.bf16.mxu0 %v5567_v42 }
 0x4bc   :  { %3981 = vmatpush1.bf16.msra.mxu0 %v5565_v43 }
 0x4bd   :  { %3982 = vmatprep.subr.bf16.mxu0 %v5570_v44 }
 0x4c0   :  { %3983 = vmatpush1.bf16.msra.mxu0 %v5568_v45 }
 0x4c1   :  { %3984 = vmatprep.subr.bf16.mxu0 %v5573_v46 }
 0x4c4   :  { %3985 = vmatpush1.bf16.msra.mxu0 %v5571_v47 }
 0x4c7   :  { %3987 = vmatmul.mubr.bf16.vlgmr.msra.gmra.mrb[12].mxu0 %v6923_v60 }
 0x51a   :  { %v3816_v53 = vpop.f32.mrb[8].mxu0  ;;  %v3902_v54 = vpop.f32.mrb[16].mxu1 }
 0x51b   :  { %v4884_v60 = vadd.f32 %v3816_v53, %v2555_v49  ;;  %v4888_v55 = vadd.f32 %v3902_v54, %v2563_v50  ;;  %v3818_v56 = vpop.f32.mrb[9].mxu0  ;;  %v3904_v57 = vpop.f32.mrb[17].mxu1 }
 0x51c   :  { %v4885_v58 = vadd.f32 %v3818_v56, %v2559_v51  ;;  %v4889_v4 = vadd.f32 %v3904_v57, %v2567_v52  ;;  %v3820_v5 = vpop.f32.mrb[10].mxu0  ;;  %v3906_v7 = vpop.f32.mrb[18].mxu1 }
 0x51d   :  { %v4658_v1 = vmul.f32 -1.442695, %v4884_v60  ;;  %v4660_v9 = vmul.f32 -1.442695, %v4888_v55  ;;  %v4886_v10 = vadd.f32 %v3820_v5, %v2555_v49  ;;  %v4890_v61 = vadd.f32 %v3906_v7, %v2563_v50  ;;  %v3822_v11 = vpop.f32.mrb[11].mxu0  ;;  %v3908_v12 = vpop.f32.mrb[19].mxu1 }
 0x51e   :  { %v4659_v3 = vmul.f32 -1.442695, %v4885_v58  ;;  %v4661_v13 = vmul.f32 -1.442695, %v4889_v4  ;;  %v4887_v14 = vadd.f32 %v3822_v11, %v2559_v51  ;;  %v4891_v6 = vadd.f32 %v3908_v12, %v2567_v52 }
 0x51f   :  { %5578 = vpow2.f32 %v4658_v1  ;;  %v4665_v16 = vmul.f32 -1.442695, %v4886_v10  ;;  %v4667_v18 = vmul.f32 -1.442695, %v4890_v61 }
 0x520   :  { %5580 = vpow2.f32 %v4660_v9  ;;  %v4666_v2 = vmul.f32 -1.442695, %v4887_v14  ;;  %v4668_v19 = vmul.f32 -1.442695, %v4891_v6 }
 0x521   :  { %5582 = vpow2.f32 %v4659_v3 }
 0x522   :  { %5584 = vpow2.f32 %v4661_v13 }
 0x523   :  { %5586 = vpow2.f32 %v4665_v16 }
 0x524   :  { %5588 = vpow2.f32 %v4667_v18 }
 0x525   :  { %5590 = vpow2.f32 %v4666_v2 }
 0x526   :  { %5592 = vpow2.f32 %v4668_v19 }
 0x529   :  { %v5579_v20 = vpop.eup %5578 }
 0x52a   :  { %v5581_v22 = vpop.eup %5580  ;;  %v4121_v15 = vadd.f32 1.0, %v5579_v20 }
 0x52b   :  { %v5583_v17 = vpop.eup %5582  ;;  %v4123_v21 = vadd.f32 1.0, %v5581_v22 }
 0x52c   :  { %v5585_v62 = vpop.eup %5584  ;;  %5594 = vrcp.f32 %v4121_v15  ;;  %v4122_v24 = vadd.f32 1.0, %v5583_v17 }
 0x52d   :  { %v5587_v25 = vpop.eup %5586  ;;  %5596 = vrcp.f32 %v4123_v21  ;;  %v4124_v59 = vadd.f32 1.0, %v5585_v62 }
 0x52e   :  { %v5589_v63 = vpop.eup %5588  ;;  %5598 = vrcp.f32 %v4122_v24  ;;  %v4128_v26 = vadd.f32 1.0, %v5587_v25 }
 0x52f   :  { %v5591_v27 = vpop.eup %5590  ;;  %5600 = vrcp.f32 %v4124_v59  ;;  %v4130_v28 = vadd.f32 1.0, %v5589_v63 }
 0x530   :  { %v5593_v23 = vpop.eup %5592  ;;  %5602 = vrcp.f32 %v4128_v26  ;;  %v4129_v29 = vadd.f32 1.0, %v5591_v27 }
 0x531   :  { %5604 = vrcp.f32 %v4130_v28  ;;  %v4131_v30 = vadd.f32 1.0, %v5593_v23 }
 0x532   :  { %5606 = vrcp.f32 %v4129_v29 }
 0x533   :  { %5608 = vrcp.f32 %v4131_v30 }
 0x536   :  { %v5595_v31 = vpop.eup %5594 }
 0x537   :  { %v5597_v8 = vpop.eup %5596  ;;  %4163 = vst [vmem:[#allocation2] sm:$0xff] %v5595_v31 }
 0x538   :  { %v5599_v32 = vpop.eup %5598  ;;  %4165 = vst [vmem:[#allocation2 + $0x10] sm:$0xff] %v5597_v8 }
 0x539   :  { %v5601_v33 = vpop.eup %5600  ;;  %4164 = vst [vmem:[#allocation2 + $0x8] sm:$0xff] %v5599_v32 }
 0x53a   :  { %v5603_v34 = vpop.eup %5602  ;;  %4166 = vst [vmem:[#allocation2 + $0x18] sm:$0xff] %v5601_v33 }
 0x53b   :  { %v5605_v35 = vpop.eup %5604  ;;  %4170 = vst [vmem:[#allocation2 + $0x38] sm:$0xff] %v5603_v34  ;;  %v4764_v36 = vpop.f32.mrb[20].mxu1 }
 0x53c   :  { %v5607_v37 = vpop.eup %5606  ;;  %4172 = vst [vmem:[#allocation2 + $0x48] sm:$0xff] %v5605_v35  ;;  %v4765_v38 = vpop.f32.mrb[21].mxu1 }
 0x53d   :  { %v5609_v39 = vpop.eup %5608  ;;  %4171 = vst [vmem:[#allocation2 + $0x40] sm:$0xff] %v5607_v37  ;;  %v4766_v40 = vadd.f32 %v4765_v38, %v4764_v36  ;;  %v4767_v41 = vpop.f32.mrb[22].mxu1 }
 0x53e   :  { %4173 = vst [vmem:[#allocation2 + $0x50] sm:$0xff] %v5609_v39  ;;  %v4768_v42 = vpop.f32.mrb[23].mxu1 }
 0x53f   :  { %v4769_v43 = vadd.f32 %v4768_v42, %v4767_v41 }
 0x540   :  { %5645 = shalt.err (!%p5642_p4)
}
 0x541   :  { %s5646_s20 = scalar_lea.hbm %s7476_s12, 256 }
 0x542   :  { %p5647_p5 = scmp.ne.s32.totalorder %s7476_s12, %s5646_s20  ;;  %p5650_p6 = scmp.lt.u32.totalorder %s5646_s20, %s7476_s12 }
 0x544   :  { %p5652_p7 = pnand %p5650_p6, %p5647_p5 }
 0x546   :  { %5655 = shalt.err (!%p5652_p7)
}
 0x547   :  { %s5687_s21 = smov 128   ;;  %s5688_s22 = smov 8   ;;  %v2578_v44 = vsub.s32 6, %v6470_v0  ;;  %v2570_v10 = vsub.s32 4, %v6470_v0  ;;  %v2574_v61 = vsub.s32 5, %v6470_v0 }
 0x548   :  { %4203 = dma.vmem_to_hbm [thread:$0]  %s4198_s10, 256, %s7476_s12, [#allocation5], %s5687_s21, %s5687_s21, %s5688_s22  }
 0x549   :  { %v2579_v45 = vrot.slane %v7422_v48, %v2578_v44  ;;  %v2571_v11 = vrot.slane %v7422_v48, %v2570_v10  ;;  %v2575_v12 = vrot.slane %v7422_v48, %v2574_v61  ;;  %s5689_s12 = smov [#allocation2]  }
 0x54a   :  { %s4185_s25 = sshll.u32 %s5689_s12, 4  ;;  %s4186_s25 = int_to_ptr.vmem [resolvable:$true] %s4185_s25 }
 0x54b   :  { %v4032_v49 = vadd.f32 %v4766_v40, %v2579_v45  ;;  %v4035_v53 = vadd.f32 %v4769_v43, %v2579_v45  ;;  %s5656_s26 = scalar_lea.vmem %s4186_s25, 1792  ;;  %p5661_p9 = scmp.lt.s32.totalorder %s4186_s25, %s4186_s25 }
 0x54c   :  { %p5657_p8 = scmp.ne.s32.totalorder %s4186_s25, %s5656_s26  ;;  %p5662_p10 = scmp.lt.s32.totalorder %s5656_s26, %s5656_s26 }
 0x54e   :  { %p5663_p11 = por %p5662_p10, %p5661_p9 }
 0x550   :  { %p5664_p12 = pnand %p5663_p11, %p5657_p8 }
 0x55b   :  { %v4786_v46 = vpop.f32.mrb[24].mxu1 }
 0x55c   :  { %v4787_v47 = vpop.f32.mrb[25].mxu1 }
 0x55d   :  { %v4788_v50 = vadd.f32 %v4787_v47, %v4786_v46  ;;  %v4789_v51 = vpop.f32.mrb[26].mxu1 }
 0x55e   :  { %v4790_v52 = vpop.f32.mrb[27].mxu1 }
 0x55f   :  { %v4073_v54 = vadd.f32 %v4788_v50, %v4032_v49  ;;  %v4791_v60 = vadd.f32 %v4790_v52, %v4789_v51 }
 0x561   :  { %v4664_v55 = vmul.f32 -1.442695, %v4073_v54  ;;  %v4076_v56 = vadd.f32 %v4791_v60, %v4035_v53 }
 0x563   :  { %5610 = vpow2.f32 %v4664_v55  ;;  %v4671_v57 = vmul.f32 -1.442695, %v4076_v56 }
 0x565   :  { %5612 = vpow2.f32 %v4671_v57 }
 0x56d   :  { %v5611_v58 = vpop.eup %5610 }
 0x56e   :  { %v4127_v4 = vadd.f32 1.0, %v5611_v58 }
 0x56f   :  { %v5613_v5 = vpop.eup %5612 }
 0x570   :  { %5614 = vrcp.f32 %v4127_v4  ;;  %v4134_v7 = vadd.f32 1.0, %v5613_v5 }
 0x572   :  { %5616 = vrcp.f32 %v4134_v7 }
 0x57a   :  { %v5615_v1 = vpop.eup %5614 }
 0x57b   :  { %4169 = vst.msk [vmem:[#allocation2 + $0x30] sm:$0xff] %vm1284_vm0, %v5615_v1 }
 0x57c   :  { %v5617_v9 = vpop.eup %5616 }
 0x57d   :  { %4176 = vst.msk [vmem:[#allocation2 + $0x68] sm:$0xff] %vm1284_vm0, %v5617_v9 }
 0x59a   :  { %v3988_v3 = vpop.f32.mrb[12].mxu0 }
 0x59b   :  { %v4892_v13 = vadd.f32 %v3988_v3, %v2571_v11  ;;  %v3990_v14 = vpop.f32.mrb[13].mxu0 }
 0x59c   :  { %v4893_v6 = vadd.f32 %v3990_v14, %v2575_v12  ;;  %v3992_v16 = vpop.f32.mrb[14].mxu0 }
 0x59d   :  { %v4662_v18 = vmul.f32 -1.442695, %v4892_v13  ;;  %v4894_v2 = vadd.f32 %v3992_v16, %v2571_v11  ;;  %v3994_v19 = vpop.f32.mrb[15].mxu0 }
 0x59e   :  { %v4663_v20 = vmul.f32 -1.442695, %v4893_v6  ;;  %v4895_v22 = vadd.f32 %v3994_v19, %v2575_v12 }
 0x59f   :  { %5618 = vpow2.f32 %v4662_v18  ;;  %v4669_v15 = vmul.f32 -1.442695, %v4894_v2 }
 0x5a0   :  { %5620 = vpow2.f32 %v4663_v20  ;;  %v4670_v17 = vmul.f32 -1.442695, %v4895_v22 }
 0x5a1   :  { %5622 = vpow2.f32 %v4669_v15 }
 0x5a2   :  { %5624 = vpow2.f32 %v4670_v17 }
 0x5a9   :  { %v5619_v0 = vpop.eup %5618 }
 0x5aa   :  { %v5621_v21 = vpop.eup %5620  ;;  %v4125_v62 = vadd.f32 1.0, %v5619_v0 }
 0x5ab   :  { %v5623_v48 = vpop.eup %5622  ;;  %v4126_v24 = vadd.f32 1.0, %v5621_v21 }
 0x5ac   :  { %v5625_v25 = vpop.eup %5624  ;;  %5626 = vrcp.f32 %v4125_v62  ;;  %v4132_v59 = vadd.f32 1.0, %v5623_v48 }
 0x5ad   :  { %5628 = vrcp.f32 %v4126_v24  ;;  %v4133_v63 = vadd.f32 1.0, %v5625_v25 }
 0x5ae   :  { %5630 = vrcp.f32 %v4132_v59 }
 0x5af   :  { %5632 = vrcp.f32 %v4133_v63 }
 0x5b6   :  { %v5627_v26 = vpop.eup %5626 }
 0x5b7   :  { %v5629_v27 = vpop.eup %5628  ;;  %4167 = vst [vmem:[#allocation2 + $0x20] sm:$0xff] %v5627_v26 }
 0x5b8   :  { %v5631_v28 = vpop.eup %5630  ;;  %4168 = vst [vmem:[#allocation2 + $0x28] sm:$0xff] %v5629_v27 }
 0x5b9   :  { %v5633_v23 = vpop.eup %5632  ;;  %4174 = vst [vmem:[#allocation2 + $0x58] sm:$0xff] %v5631_v28 }
 0x5ba   :  { %4175 = vst [vmem:[#allocation2 + $0x60] sm:$0xff] %v5633_v23 }
 0x5bb   :  { %5667 = shalt.err (!%p5664_p12)
}
 0x5bc   :  { %s5668_s1 = scalar_lea.hbm %s7475_s11, 1792 }
 0x5bd   :  { %p5669_p13 = scmp.ne.s32.totalorder %s7475_s11, %s5668_s1  ;;  %p5672_p0 = scmp.lt.u32.totalorder %s5668_s1, %s7475_s11 }
 0x5bf   :  { %p5674_p1 = pnand %p5672_p0, %p5669_p13 }
 0x5c1   :  { %5677 = shalt.err (!%p5674_p1)
}
 0x5c2   :  { %s5690_s5 = smov 896   ;;  %s5691_s0 = smov 56  }
 0x5c3   :  { %4191 = dma.vmem_to_hbm [thread:$0]  %s4186_s25, 1792, %s7475_s11, [#allocation3], %s5690_s5, %s5690_s5, %s5691_s0  }
 0x5c4   :  { %5678 = dma.done.wait [#allocation3], 1792  }
 0x5c5   :  { %5679 = vsyncadd [#allocation3], 4294965504 }
 0x5c6   :  { %5680 = dma.done.wait [#allocation5], 256  }
 0x5c7   :  { %5681 = vsyncadd [#allocation5], 4294967040 }
 0x5c8   :  { %4210 = vsyncpa [#allocation3], 1 }
 0x5c9   :  { %4211 = vsyncpa [#allocation5], 1 }

</bundles_post_ra>
